<compile_context>
chip_gen: v7x
topology: tpu7x:2x2x1
jax: 0.10.0
libtpu: 0.0.40
codegen_flags: <defaults>
</compile_context>

<pallas_src>
import functools

import jax
import jax.numpy as jnp
from jax.experimental import pallas as pl
from jax.experimental.pallas import tpu as pltpu

_VMEM_LIMIT_BYTES = 48 * 1024 * 1024   # leaves headroom inside v7x's 64 MiB
_LN_EPS = 1e-5                         # nn.LayerNorm default
_ATTN_EPS = 1e-6                       # LoFTR LinearAttention eps


def _elu_plus_one(x):
    # elu(x)+1 (alpha=1); exp(min(x,0)) avoids generating inf on the dead branch.
    return jnp.where(x > 0, x + 1.0, jnp.exp(jnp.minimum(x, 0.0)))


def _layer_norm(x, gamma, beta, c_real, c_pad):
    # LayerNorm over the last dim, PyTorch (biased variance) semantics.
    # Channels >= c_real are exactly zero, so real-channel statistics can be
    # recovered from full-width (lane-dense) reductions.
    s = jnp.sum(x, axis=-1, keepdims=True)
    mu = s * (1.0 / c_real)
    xc = x - mu
    ss = jnp.sum(xc * xc, axis=-1, keepdims=True)
    var = (ss - (c_pad - c_real) * mu * mu) * (1.0 / c_real)
    var = jnp.maximum(var, 0.0)
    inv = jax.lax.rsqrt(var + _LN_EPS)
    return xc * inv * gamma + beta


def _pos_mlp(xyz, pw1, pb1, pw2, pb2):
    # Linear(3->C) (f32, tiny 8-wide contraction) -> ReLU -> Linear(C->C) (bf16).
    h = jnp.dot(xyz, pw1, preferred_element_type=jnp.float32) + pb1
    h = jnp.maximum(h, 0.0)
    return jnp.dot(h.astype(jnp.bfloat16), pw2,
                   preferred_element_type=jnp.float32) + pb2


# ----------------------------- pass 1: reduce -------------------------------

def _reduce_kernel(feat_ref, xyz_ref, pw1_ref, pb1_ref, pw2_ref, pb2_ref,
                   wk_ref, wv_ref, ksum_ref, kv_ref, *, inv_n):
    t = pl.program_id(1)
    feat = feat_ref[0]                                    # [NT, Cp] f32
    xyz = xyz_ref[0]                                      # [NT, 8]  f32

    pos = _pos_mlp(xyz, pw1_ref[...], pb1_ref[...], pw2_ref[...], pb2_ref[...])
    fp = (feat + pos).astype(jnp.bfloat16)                # [NT, Cp]

    k = jnp.dot(fp, wk_ref[...], preferred_element_type=jnp.float32)
    v = jnp.dot(fp, wv_ref[...], preferred_element_type=jnp.float32)
    kf = _elu_plus_one(k)                                 # f32
    vs = (v * inv_n).astype(jnp.bfloat16)                 # 1/N pre-scale

    # KV_tile = kf^T @ vs without an explicit transpose (contract token axis).
    kv_tile = jax.lax.dot_general(kf.astype(jnp.bfloat16), vs,
                                  (((0,), (0,)), ((), ())),
                                  preferred_element_type=jnp.float32)
    ks_tile = jnp.sum(kf, axis=0, keepdims=True)          # [1, Cp] f32

    @pl.when(t == 0)
    def _():
        ksum_ref[0] = ks_tile
        kv_ref[0] = kv_tile

    @pl.when(t > 0)
    def _():
        ksum_ref[0] = ksum_ref[0] + ks_tile
        kv_ref[0] = kv_ref[0] + kv_tile


# ------------------------------ pass 2: apply --------------------------------

def _apply_kernel(feat_ref, xyz_ref, ksum_ref, kv_ref, mask_ref,
                  pw1_ref, pb1_ref, pw2_ref, pb2_ref,
                  wq_ref, wmerge_ref, g1_ref, b1_ref,
                  w1a_ref, w1b_ref, w2_ref, g2_ref, b2_ref,
                  out_ref, *, n_scale, c_real, c_pad):
    feat = feat_ref[0]                                    # [NT, Cp] f32
    xyz = xyz_ref[0]                                      # [NT, 8]  f32
    ksum = ksum_ref[0]                                    # [1, Cp]  f32
    kv = kv_ref[0]                                        # [Cp, Cp] f32
    mask = mask_ref[...]                                  # [Cp, Cp] block-diag head mask

    pos = _pos_mlp(xyz, pw1_ref[...], pb1_ref[...], pw2_ref[...], pb2_ref[...])
    fp = feat + pos
    q = jnp.dot(fp.astype(jnp.bfloat16), wq_ref[...],
                preferred_element_type=jnp.float32)
    qf = _elu_plus_one(q)                                 # [NT, Cp] f32

    # All heads in one dense matmul; the block-diagonal mask removes the
    # cross-head terms a per-head loop would never produce.
    kv_m = (kv * mask).astype(jnp.bfloat16)
    msg = jnp.dot(qf.astype(jnp.bfloat16), kv_m,
                  preferred_element_type=jnp.float32)     # [NT, Cp]
    # Per-head denominator broadcast back to channels, kept in f32.
    denom = jnp.dot(qf * ksum, mask, preferred_element_type=jnp.float32)
    z = pl.reciprocal(denom + _ATTN_EPS, approx=True)
    msg = msg * z * n_scale

    # merge + norm1
    msg = jnp.dot(msg.astype(jnp.bfloat16), wmerge_ref[...],
                  preferred_element_type=jnp.float32)
    msg = _layer_norm(msg, g1_ref[...], b1_ref[...], c_real, c_pad)

    # MLP on concat([feat, message]) without the lane concat: split weights.
    hid = (jnp.dot(feat.astype(jnp.bfloat16), w1a_ref[...],
                   preferred_element_type=jnp.float32)
           + jnp.dot(msg.astype(jnp.bfloat16), w1b_ref[...],
                     preferred_element_type=jnp.float32))
    hid = jnp.maximum(hid, 0.0)
    m = jnp.dot(hid.astype(jnp.bfloat16), w2_ref[...],
                preferred_element_type=jnp.float32)
    m = _layer_norm(m, g2_ref[...], b2_ref[...], c_real, c_pad)

    out_ref[0] = feat + m


# --------------------------------- wrapper -----------------------------------

def _pick_n_tile(n):
    for t in (512, 256, 128):
        if n % t == 0:
            return t
    return n


def _pad_to(x, shape):
    pads = [(0, t - s) for s, t in zip(x.shape, shape)]
    return jnp.pad(x, pads)


def self_attention_forward(feat_bcn, xyz, params, *, nhead):
    """feat_bcn: [B, C, N] f32, xyz: [B, N, 3] f32 -> [B, C, N] f32."""
    B, C, N = feat_bcn.shape
    assert C % nhead == 0
    D = C // nhead
    Cp = ((C + 127) // 128) * 128           # lane-dense channel dim
    NT = _pick_n_tile(N)
    n_tiles = N // NT

    f32, bf16 = jnp.float32, jnp.bfloat16

    # Lane-dense activations (pad channels / xyz to aligned widths).
    # TODO(synk): the [B,C,N]<->[B,N,C] HBM transposes would disappear entirely
    # if the surrounding model kept features channels-last.
    feat = jnp.transpose(feat_bcn, (0, 2, 1)).astype(f32)        # [B, N, C]
    if Cp != C:
        feat = _pad_to(feat, (B, N, Cp))
    xyz8 = _pad_to(xyz.astype(f32), (B, N, 8))                   # [B, N, 8]

    # Weights: pad to Cp, cast matmul operands to bf16 (biases/LN params f32).
    pw1 = _pad_to(params["pos_w1"], (8, Cp)).astype(f32)
    pb1 = _pad_to(params["pos_b1"], (1, Cp)).astype(f32)
    pw2 = _pad_to(params["pos_w2"], (Cp, Cp)).astype(bf16)
    pb2 = _pad_to(params["pos_b2"], (1, Cp)).astype(f32)
    wq = _pad_to(params["wq"], (Cp, Cp)).astype(bf16)
    wk = _pad_to(params["wk"], (Cp, Cp)).astype(bf16)
    wv = _pad_to(params["wv"], (Cp, Cp)).astype(bf16)
    wmerge = _pad_to(params["wmerge"], (Cp, Cp)).astype(bf16)
    g1 = _pad_to(params["norm1_g"], (1, Cp)).astype(f32)
    b1 = _pad_to(params["norm1_b"], (1, Cp)).astype(f32)
    w1a = _pad_to(params["mlp_w1"][:C, :], (Cp, 2 * Cp)).astype(bf16)
    w1b = _pad_to(params["mlp_w1"][C:, :], (Cp, 2 * Cp)).astype(bf16)
    w2 = _pad_to(params["mlp_w2"], (2 * Cp, Cp)).astype(bf16)
    g2 = _pad_to(params["norm2_g"], (1, Cp)).astype(f32)
    b2 = _pad_to(params["norm2_b"], (1, Cp)).astype(f32)

    # Static block-diagonal head mask over the real channels.
    idx = jnp.arange(Cp)
    same_head = (idx[:, None] // D) == (idx[None, :] // D)
    valid = (idx[:, None] < C) & (idx[None, :] < C)
    head_mask = (same_head & valid).astype(f32)                  # [Cp, Cp]

    def rep(shape):
        return pl.BlockSpec(shape, lambda b, t: (0,) * len(shape))

    feat_spec = pl.BlockSpec((1, NT, Cp), lambda b, t: (b, t, 0))
    xyz_spec = pl.BlockSpec((1, NT, 8), lambda b, t: (b, t, 0))
    ksum_spec = pl.BlockSpec((1, 1, Cp), lambda b, t: (b, 0, 0))
    kv_spec = pl.BlockSpec((1, Cp, Cp), lambda b, t: (b, 0, 0))

    # ---------------- pass 1: accumulate ksum [1,Cp] and KV [Cp,Cp] ----------
    reduce_cost = pl.CostEstimate(
        flops=int(2 * B * N * Cp * (8 + 4 * Cp)),
        transcendentals=int(B * N * Cp),
        bytes_accessed=int(4 * B * N * (Cp + 8) + 4 * B * Cp * (Cp + 1)
                           + 2 * 3 * Cp * Cp),
    )
    ksum, kv = pl.pallas_call(
        functools.partial(_reduce_kernel, inv_n=1.0 / float(N)),
        out_shape=(jax.ShapeDtypeStruct((B, 1, Cp), f32),
                   jax.ShapeDtypeStruct((B, Cp, Cp), f32)),
        grid_spec=pltpu.PrefetchScalarGridSpec(
            num_scalar_prefetch=0,
            grid=(B, n_tiles),
            in_specs=[
                feat_spec, xyz_spec,
                rep((8, Cp)), rep((1, Cp)), rep((Cp, Cp)), rep((1, Cp)),
                rep((Cp, Cp)), rep((Cp, Cp)),
            ],
            out_specs=(ksum_spec, kv_spec),
        ),
        compiler_params=pltpu.CompilerParams(
            dimension_semantics=("parallel", "arbitrary"),
            vmem_limit_bytes=_VMEM_LIMIT_BYTES),
        cost_estimate=reduce_cost,
    )(feat, xyz8, pw1, pb1, pw2, pb2, wk, wv)

    # ---------------- pass 2: apply attention + merge + MLP + residual -------
    apply_cost = pl.CostEstimate(
        flops=int(2 * B * N * Cp * (8 + 11 * Cp)),
        transcendentals=int(B * N * Cp),
        bytes_accessed=int(4 * B * N * (2 * Cp + 8) + 4 * B * Cp * (Cp + 1)
                           + 2 * 9 * Cp * Cp),
    )
    out_bnc = pl.pallas_call(
        functools.partial(_apply_kernel, n_scale=float(N), c_real=C, c_pad=Cp),
        out_shape=jax.ShapeDtypeStruct((B, N, Cp), f32),
        grid_spec=pltpu.PrefetchScalarGridSpec(
            num_scalar_prefetch=0,
            grid=(B, n_tiles),
            in_specs=[
                feat_spec, xyz_spec, ksum_spec, kv_spec,
                rep((Cp, Cp)),                                   # head mask
                rep((8, Cp)), rep((1, Cp)), rep((Cp, Cp)), rep((1, Cp)),
                rep((Cp, Cp)), rep((Cp, Cp)),                    # wq, wmerge
                rep((1, Cp)), rep((1, Cp)),                      # norm1
                rep((Cp, 2 * Cp)), rep((Cp, 2 * Cp)), rep((2 * Cp, Cp)),
                rep((1, Cp)), rep((1, Cp)),                      # norm2
            ],
            out_specs=pl.BlockSpec((1, NT, Cp), lambda b, t: (b, t, 0)),
        ),
        compiler_params=pltpu.CompilerParams(
            dimension_semantics=("parallel", "parallel"),
            vmem_limit_bytes=_VMEM_LIMIT_BYTES),
        cost_estimate=apply_cost,
    )(feat, xyz8, ksum, kv, head_mask,
      pw1, pb1, pw2, pb2, wq, wmerge, g1, b1, w1a, w1b, w2, g2, b2)

    return jnp.transpose(out_bnc[..., :C], (0, 2, 1))            # back to [B, C, N]


def init_params(key, d_model):
    """Deterministic synthetic weights (shapes match the nn.Module)."""
    ks = jax.random.split(key, 10)
    s = 0.1
    C = d_model
    return {
        # weights stored as (in, out) so the kernel does x @ W (== PyTorch x @ W.T)
        "pos_w1": s * jax.random.normal(ks[0], (3, C), jnp.float32),
        "pos_b1": s * jax.random.normal(ks[1], (1, C), jnp.float32),
        "pos_w2": s * jax.random.normal(ks[2], (C, C), jnp.float32),
        "pos_b2": s * jax.random.normal(ks[3], (1, C), jnp.float32),
        "wq": s * jax.random.normal(ks[4], (C, C), jnp.float32),
        "wk": s * jax.random.normal(ks[5], (C, C), jnp.float32),
        "wv": s * jax.random.normal(ks[6], (C, C), jnp.float32),
        "wmerge": s * jax.random.normal(ks[7], (C, C), jnp.float32),
        "norm1_g": jnp.ones((1, C), jnp.float32),
        "norm1_b": jnp.zeros((1, C), jnp.float32),
        "mlp_w1": s * jax.random.normal(ks[8], (2 * C, 2 * C), jnp.float32),
        "mlp_w2": s * jax.random.normal(ks[9], (2 * C, C), jnp.float32),
        "norm2_g": jnp.ones((1, C), jnp.float32),
        "norm2_b": jnp.zeros((1, C), jnp.float32),
    }


if __name__ == "__main__":
    B, d_model, nhead, N = 2, 32, 4, 16

    key = jax.random.PRNGKey(0)
    k_feat, k_xyz, k_params = jax.random.split(key, 3)

    feat = jax.random.normal(k_feat, (B, d_model, N), jnp.float32)   # [B, C, N]
    xyz = jax.random.normal(k_xyz, (B, N, 3), jnp.float32)           # [B, N, 3]
    params = init_params(k_params, d_model)

    fwd = jax.jit(functools.partial(self_attention_forward, nhead=nhead))
    out = jax.block_until_ready(fwd(feat, xyz, params))

    assert out.shape == (B, d_model, N), out.shape
    assert bool(jnp.all(jnp.isfinite(out)))
    print("KERNEL_OK")
</pallas_src>

<mosaic_0001>
module attributes {stable_mosaic.version = 11 : i64} {
  func.func @_reduce_kernel(%arg0: i32, %arg1: i32, %arg2: memref<1x16x128xf32, #tpu.memory_space<vmem>>, %arg3: memref<1x16x8xf32, #tpu.memory_space<vmem>>, %arg4: memref<8x128xf32, #tpu.memory_space<vmem>>, %arg5: memref<1x128xf32, #tpu.memory_space<vmem>>, %arg6: memref<128x128xbf16, #tpu.memory_space<vmem>>, %arg7: memref<1x128xf32, #tpu.memory_space<vmem>>, %arg8: memref<128x128xbf16, #tpu.memory_space<vmem>>, %arg9: memref<128x128xbf16, #tpu.memory_space<vmem>>, %arg10: memref<1x1x128xf32, #tpu.memory_space<vmem>>, %arg11: memref<1x128x128xf32, #tpu.memory_space<vmem>>) attributes {dimension_semantics = [#tpu.dimension_semantics<parallel>, #tpu.dimension_semantics<arbitrary>], iteration_bounds = array<i64: 2, 1>, scalar_prefetch = 0 : i64, scratch_operands = 0 : i64, tpu.core_type = #tpu.core_type<tc>, window_params = [{transform_indices = @transform_0, window_bounds = array<i64: 1, 16, 128>}, {transform_indices = @transform_1, window_bounds = array<i64: 1, 16, 8>}, {pipeline_mode = #tpu.pipeline_mode<synchronous>, transform_indices = @transform_2, window_bounds = array<i64: 8, 128>}, {pipeline_mode = #tpu.pipeline_mode<synchronous>, transform_indices = @transform_3, window_bounds = array<i64: 1, 128>}, {pipeline_mode = #tpu.pipeline_mode<synchronous>, transform_indices = @transform_4, window_bounds = array<i64: 128, 128>}, {pipeline_mode = #tpu.pipeline_mode<synchronous>, transform_indices = @transform_5, window_bounds = array<i64: 1, 128>}, {pipeline_mode = #tpu.pipeline_mode<synchronous>, transform_indices = @transform_6, window_bounds = array<i64: 128, 128>}, {pipeline_mode = #tpu.pipeline_mode<synchronous>, transform_indices = @transform_7, window_bounds = array<i64: 128, 128>}, {transform_indices = @transform_8, window_bounds = array<i64: 1, 1, 128>}, {transform_indices = @transform_9, window_bounds = array<i64: 1, 128, 128>}]} {
    %c0 = arith.constant 0 : index
    %c0_0 = arith.constant 0 : index
    %c0_1 = arith.constant 0 : index
    %0 = vector.load %arg2[%c0, %c0_0, %c0_1] : memref<1x16x128xf32, #tpu.memory_space<vmem>>, vector<1x16x128xf32>
    %1 = vector.shape_cast %0 : vector<1x16x128xf32> to vector<16x128xf32>
    %c0_2 = arith.constant 0 : index
    %c0_3 = arith.constant 0 : index
    %c0_4 = arith.constant 0 : index
    %2 = vector.load %arg3[%c0_2, %c0_3, %c0_4] : memref<1x16x8xf32, #tpu.memory_space<vmem>>, vector<1x16x8xf32>
    %3 = vector.shape_cast %2 : vector<1x16x8xf32> to vector<16x8xf32>
    %c0_5 = arith.constant 0 : index
    %c0_6 = arith.constant 0 : index
    %4 = vector.load %arg4[%c0_5, %c0_6] : memref<8x128xf32, #tpu.memory_space<vmem>>, vector<8x128xf32>
    %c0_7 = arith.constant 0 : index
    %c0_8 = arith.constant 0 : index
    %5 = vector.load %arg5[%c0_7, %c0_8] : memref<1x128xf32, #tpu.memory_space<vmem>>, vector<1x128xf32>
    %c0_9 = arith.constant 0 : index
    %c0_10 = arith.constant 0 : index
    %6 = vector.load %arg6[%c0_9, %c0_10] : memref<128x128xbf16, #tpu.memory_space<vmem>>, vector<128x128xbf16>
    %c0_11 = arith.constant 0 : index
    %c0_12 = arith.constant 0 : index
    %7 = vector.load %arg7[%c0_11, %c0_12] : memref<1x128xf32, #tpu.memory_space<vmem>>, vector<1x128xf32>
    %cst = arith.constant dense<0.000000e+00> : vector<16x128xf32>
    %8 = tpu.matmul %3, %4, %cst {dimension_numbers = #tpu.dot_dimension_numbers<[1], [0], [0], [1], [0, 0, 1, 1], [], []>} : vector<16x8xf32>, vector<8x128xf32>, vector<16x128xf32> -> vector<16x128xf32>
    %9 = vector.broadcast %5 : vector<1x128xf32> to vector<16x128xf32>
    %10 = arith.addf %8, %9 : vector<16x128xf32>
    %cst_13 = arith.constant 0.000000e+00 : f32
    %11 = vector.broadcast %cst_13 : f32 to vector<16x128xf32>
    %12 = arith.maximumf %10, %11 : vector<16x128xf32>
    %13 = arith.truncf %12 : vector<16x128xf32> to vector<16x128xbf16>
    %cst_14 = arith.constant dense<0.000000e+00> : vector<16x128xf32>
    %14 = tpu.matmul %13, %6, %cst_14 {dimension_numbers = #tpu.dot_dimension_numbers<[1], [0], [0], [1], [0, 0, 1, 1], [], []>} : vector<16x128xbf16>, vector<128x128xbf16>, vector<16x128xf32> -> vector<16x128xf32>
    %15 = vector.broadcast %7 : vector<1x128xf32> to vector<16x128xf32>
    %16 = arith.addf %14, %15 : vector<16x128xf32>
    %17 = arith.addf %1, %16 : vector<16x128xf32>
    %18 = arith.truncf %17 : vector<16x128xf32> to vector<16x128xbf16>
    %c0_15 = arith.constant 0 : index
    %c0_16 = arith.constant 0 : index
    %19 = vector.load %arg8[%c0_15, %c0_16] : memref<128x128xbf16, #tpu.memory_space<vmem>>, vector<128x128xbf16>
    %cst_17 = arith.constant dense<0.000000e+00> : vector<16x128xf32>
    %20 = tpu.matmul %18, %19, %cst_17 {dimension_numbers = #tpu.dot_dimension_numbers<[1], [0], [0], [1], [0, 0, 1, 1], [], []>} : vector<16x128xbf16>, vector<128x128xbf16>, vector<16x128xf32> -> vector<16x128xf32>
    %c0_18 = arith.constant 0 : index
    %c0_19 = arith.constant 0 : index
    %21 = vector.load %arg9[%c0_18, %c0_19] : memref<128x128xbf16, #tpu.memory_space<vmem>>, vector<128x128xbf16>
    %cst_20 = arith.constant dense<0.000000e+00> : vector<16x128xf32>
    %22 = tpu.matmul %18, %21, %cst_20 {dimension_numbers = #tpu.dot_dimension_numbers<[1], [0], [0], [1], [0, 0, 1, 1], [], []>} : vector<16x128xbf16>, vector<128x128xbf16>, vector<16x128xf32> -> vector<16x128xf32>
    %cst_21 = arith.constant 0.000000e+00 : f32
    %23 = vector.broadcast %cst_21 : f32 to vector<16x128xf32>
    %24 = arith.cmpf ogt, %20, %23 : vector<16x128xf32>
    %cst_22 = arith.constant 1.000000e+00 : f32
    %25 = vector.broadcast %cst_22 : f32 to vector<16x128xf32>
    %26 = arith.addf %20, %25 : vector<16x128xf32>
    %cst_23 = arith.constant 0.000000e+00 : f32
    %27 = vector.broadcast %cst_23 : f32 to vector<16x128xf32>
    %28 = arith.minimumf %20, %27 : vector<16x128xf32>
    %29 = math.exp %28 : vector<16x128xf32>
    %30 = arith.select %24, %26, %29 : vector<16x128xi1>, vector<16x128xf32>
    %cst_24 = arith.constant 6.250000e-02 : f32
    %31 = vector.broadcast %cst_24 : f32 to vector<16x128xf32>
    %32 = arith.mulf %22, %31 : vector<16x128xf32>
    %33 = arith.truncf %32 : vector<16x128xf32> to vector<16x128xbf16>
    %34 = arith.truncf %30 : vector<16x128xf32> to vector<16x128xbf16>
    %cst_25 = arith.constant dense<0.000000e+00> : vector<128x128xf32>
    %35 = tpu.matmul %34, %33, %cst_25 {dimension_numbers = #tpu.dot_dimension_numbers<[0], [0], [1], [1], [0, 1, 1, 1], [], []>} : vector<16x128xbf16>, vector<16x128xbf16>, vector<128x128xf32> -> vector<128x128xf32>
    %cst_26 = arith.constant dense<0.000000e+00> : vector<128xf32>
    %36 = vector.multi_reduction <add>, %30, %cst_26 [0] : vector<16x128xf32> to vector<128xf32>
    %37 = vector.shape_cast %36 : vector<128xf32> to vector<1x128xf32>
    %c0_i32 = arith.constant 0 : i32
    %38 = arith.cmpi eq, %arg1, %c0_i32 : i32
    %39 = arith.extui %38 : i1 to i32
    %c0_i32_27 = arith.constant 0 : i32
    %40 = arith.cmpi ne, %39, %c0_i32_27 : i32
    scf.if %40 {
      %c0_30 = arith.constant 0 : index
      %c0_31 = arith.constant 0 : index
      %c0_32 = arith.constant 0 : index
      %44 = vector.load %arg10[%c0_30, %c0_31, %c0_32] : memref<1x1x128xf32, #tpu.memory_space<vmem>>, vector<1x1x128xf32>
      %45 = vector.shape_cast %44 : vector<1x1x128xf32> to vector<1x128xf32>
      %46 = vector.shape_cast %37 : vector<1x128xf32> to vector<1x1x128xf32>
      tpu.vector_store %arg10[%c0_30, %c0_31, %c0_32], %46 {strides = array<i32>} : memref<1x1x128xf32, #tpu.memory_space<vmem>>, vector<1x1x128xf32>,
      %c0_33 = arith.constant 0 : index
      %c0_34 = arith.constant 0 : index
      %c0_35 = arith.constant 0 : index
      %47 = vector.load %arg11[%c0_33, %c0_34, %c0_35] : memref<1x128x128xf32, #tpu.memory_space<vmem>>, vector<1x128x128xf32>
      %48 = vector.shape_cast %47 : vector<1x128x128xf32> to vector<128x128xf32>
      %49 = vector.shape_cast %35 : vector<128x128xf32> to vector<1x128x128xf32>
      tpu.vector_store %arg11[%c0_33, %c0_34, %c0_35], %49 {strides = array<i32>} : memref<1x128x128xf32, #tpu.memory_space<vmem>>, vector<1x128x128xf32>,
    } else {
    }
    %c0_i32_28 = arith.constant 0 : i32
    %41 = arith.cmpi sgt, %arg1, %c0_i32_28 : i32
    %42 = arith.extui %41 : i1 to i32
    %c0_i32_29 = arith.constant 0 : i32
    %43 = arith.cmpi ne, %42, %c0_i32_29 : i32
    scf.if %43 {
      %c0_30 = arith.constant 0 : index
      %c0_31 = arith.constant 0 : index
      %c0_32 = arith.constant 0 : index
      %44 = vector.load %arg10[%c0_30, %c0_31, %c0_32] : memref<1x1x128xf32, #tpu.memory_space<vmem>>, vector<1x1x128xf32>
      %45 = vector.shape_cast %44 : vector<1x1x128xf32> to vector<1x128xf32>
      %46 = arith.addf %45, %37 : vector<1x128xf32>
      %c0_33 = arith.constant 0 : index
      %c0_34 = arith.constant 0 : index
      %c0_35 = arith.constant 0 : index
      %47 = vector.load %arg10[%c0_33, %c0_34, %c0_35] : memref<1x1x128xf32, #tpu.memory_space<vmem>>, vector<1x1x128xf32>
      %48 = vector.shape_cast %47 : vector<1x1x128xf32> to vector<1x128xf32>
      %49 = vector.shape_cast %46 : vector<1x128xf32> to vector<1x1x128xf32>
      tpu.vector_store %arg10[%c0_33, %c0_34, %c0_35], %49 {strides = array<i32>} : memref<1x1x128xf32, #tpu.memory_space<vmem>>, vector<1x1x128xf32>,
      %c0_36 = arith.constant 0 : index
      %c0_37 = arith.constant 0 : index
      %c0_38 = arith.constant 0 : index
      %50 = vector.load %arg11[%c0_36, %c0_37, %c0_38] : memref<1x128x128xf32, #tpu.memory_space<vmem>>, vector<1x128x128xf32>
      %51 = vector.shape_cast %50 : vector<1x128x128xf32> to vector<128x128xf32>
      %52 = arith.addf %51, %35 : vector<128x128xf32>
      %c0_39 = arith.constant 0 : index
      %c0_40 = arith.constant 0 : index
      %c0_41 = arith.constant 0 : index
      %53 = vector.load %arg11[%c0_39, %c0_40, %c0_41] : memref<1x128x128xf32, #tpu.memory_space<vmem>>, vector<1x128x128xf32>
      %54 = vector.shape_cast %53 : vector<1x128x128xf32> to vector<128x128xf32>
      %55 = vector.shape_cast %52 : vector<128x128xf32> to vector<1x128x128xf32>
      tpu.vector_store %arg11[%c0_39, %c0_40, %c0_41], %55 {strides = array<i32>} : memref<1x128x128xf32, #tpu.memory_space<vmem>>, vector<1x128x128xf32>,
    } else {
    }
    return
  }
  func.func @transform_0(%arg0: i32, %arg1: i32) -> (i32, i32, i32) {
    %c0_i32 = arith.constant 0 : i32
    %c0_i32_0 = arith.constant 0 : i32
    return %arg0, %arg1, %c0_i32 : i32, i32, i32
  }
  func.func @transform_1(%arg0: i32, %arg1: i32) -> (i32, i32, i32) {
    %c0_i32 = arith.constant 0 : i32
    %c0_i32_0 = arith.constant 0 : i32
    return %arg0, %arg1, %c0_i32 : i32, i32, i32
  }
  func.func @transform_2(%arg0: i32, %arg1: i32) -> (i32, i32) {
    %c0_i32 = arith.constant 0 : i32
    %c0_i32_0 = arith.constant 0 : i32
    %c0_i32_1 = arith.constant 0 : i32
    return %c0_i32, %c0_i32_0 : i32, i32
  }
  func.func @transform_3(%arg0: i32, %arg1: i32) -> (i32, i32) {
    %c0_i32 = arith.constant 0 : i32
    %c0_i32_0 = arith.constant 0 : i32
    %c0_i32_1 = arith.constant 0 : i32
    return %c0_i32, %c0_i32_0 : i32, i32
  }
  func.func @transform_4(%arg0: i32, %arg1: i32) -> (i32, i32) {
    %c0_i32 = arith.constant 0 : i32
    %c0_i32_0 = arith.constant 0 : i32
    %c0_i32_1 = arith.constant 0 : i32
    return %c0_i32, %c0_i32_0 : i32, i32
  }
  func.func @transform_5(%arg0: i32, %arg1: i32) -> (i32, i32) {
    %c0_i32 = arith.constant 0 : i32
    %c0_i32_0 = arith.constant 0 : i32
    %c0_i32_1 = arith.constant 0 : i32
    return %c0_i32, %c0_i32_0 : i32, i32
  }
  func.func @transform_6(%arg0: i32, %arg1: i32) -> (i32, i32) {
    %c0_i32 = arith.constant 0 : i32
    %c0_i32_0 = arith.constant 0 : i32
    %c0_i32_1 = arith.constant 0 : i32
    return %c0_i32, %c0_i32_0 : i32, i32
  }
  func.func @transform_7(%arg0: i32, %arg1: i32) -> (i32, i32) {
    %c0_i32 = arith.constant 0 : i32
    %c0_i32_0 = arith.constant 0 : i32
    %c0_i32_1 = arith.constant 0 : i32
    return %c0_i32, %c0_i32_0 : i32, i32
  }
  func.func @transform_8(%arg0: i32, %arg1: i32) -> (i32, i32, i32) {
    %c0_i32 = arith.constant 0 : i32
    %c0_i32_0 = arith.constant 0 : i32
    %c0_i32_1 = arith.constant 0 : i32
    return %arg0, %c0_i32, %c0_i32_0 : i32, i32, i32
  }
  func.func @transform_9(%arg0: i32, %arg1: i32) -> (i32, i32, i32) {
    %c0_i32 = arith.constant 0 : i32
    %c0_i32_0 = arith.constant 0 : i32
    %c0_i32_1 = arith.constant 0 : i32
    return %arg0, %c0_i32, %c0_i32_0 : i32, i32, i32
  }
}

module attributes {stable_mosaic.version = 11 : i64} {
  func.func @_apply_kernel(%arg0: i32, %arg1: i32, %arg2: memref<1x16x128xf32, #tpu.memory_space<vmem>>, %arg3: memref<1x16x8xf32, #tpu.memory_space<vmem>>, %arg4: memref<1x1x128xf32, #tpu.memory_space<vmem>>, %arg5: memref<1x128x128xf32, #tpu.memory_space<vmem>>, %arg6: memref<128x128xf32, #tpu.memory_space<vmem>>, %arg7: memref<8x128xf32, #tpu.memory_space<vmem>>, %arg8: memref<1x128xf32, #tpu.memory_space<vmem>>, %arg9: memref<128x128xbf16, #tpu.memory_space<vmem>>, %arg10: memref<1x128xf32, #tpu.memory_space<vmem>>, %arg11: memref<128x128xbf16, #tpu.memory_space<vmem>>, %arg12: memref<128x128xbf16, #tpu.memory_space<vmem>>, %arg13: memref<1x128xf32, #tpu.memory_space<vmem>>, %arg14: memref<1x128xf32, #tpu.memory_space<vmem>>, %arg15: memref<128x256xbf16, #tpu.memory_space<vmem>>, %arg16: memref<128x256xbf16, #tpu.memory_space<vmem>>, %arg17: memref<256x128xbf16, #tpu.memory_space<vmem>>, %arg18: memref<1x128xf32, #tpu.memory_space<vmem>>, %arg19: memref<1x128xf32, #tpu.memory_space<vmem>>, %arg20: memref<1x16x128xf32, #tpu.memory_space<vmem>>) attributes {dimension_semantics = [#tpu.dimension_semantics<parallel>, #tpu.dimension_semantics<parallel>], iteration_bounds = array<i64: 2, 1>, scalar_prefetch = 0 : i64, scratch_operands = 0 : i64, tpu.core_type = #tpu.core_type<tc>, window_params = [{transform_indices = @transform_0, window_bounds = array<i64: 1, 16, 128>}, {transform_indices = @transform_1, window_bounds = array<i64: 1, 16, 8>}, {transform_indices = @transform_2, window_bounds = array<i64: 1, 1, 128>}, {transform_indices = @transform_3, window_bounds = array<i64: 1, 128, 128>}, {pipeline_mode = #tpu.pipeline_mode<synchronous>, transform_indices = @transform_4, window_bounds = array<i64: 128, 128>}, {pipeline_mode = #tpu.pipeline_mode<synchronous>, transform_indices = @transform_5, window_bounds = array<i64: 8, 128>}, {pipeline_mode = #tpu.pipeline_mode<synchronous>, transform_indices = @transform_6, window_bounds = array<i64: 1, 128>}, {pipeline_mode = #tpu.pipeline_mode<synchronous>, transform_indices = @transform_7, window_bounds = array<i64: 128, 128>}, {pipeline_mode = #tpu.pipeline_mode<synchronous>, transform_indices = @transform_8, window_bounds = array<i64: 1, 128>}, {pipeline_mode = #tpu.pipeline_mode<synchronous>, transform_indices = @transform_9, window_bounds = array<i64: 128, 128>}, {pipeline_mode = #tpu.pipeline_mode<synchronous>, transform_indices = @transform_10, window_bounds = array<i64: 128, 128>}, {pipeline_mode = #tpu.pipeline_mode<synchronous>, transform_indices = @transform_11, window_bounds = array<i64: 1, 128>}, {pipeline_mode = #tpu.pipeline_mode<synchronous>, transform_indices = @transform_12, window_bounds = array<i64: 1, 128>}, {pipeline_mode = #tpu.pipeline_mode<synchronous>, transform_indices = @transform_13, window_bounds = array<i64: 128, 256>}, {pipeline_mode = #tpu.pipeline_mode<synchronous>, transform_indices = @transform_14, window_bounds = array<i64: 128, 256>}, {pipeline_mode = #tpu.pipeline_mode<synchronous>, transform_indices = @transform_15, window_bounds = array<i64: 256, 128>}, {pipeline_mode = #tpu.pipeline_mode<synchronous>, transform_indices = @transform_16, window_bounds = array<i64: 1, 128>}, {pipeline_mode = #tpu.pipeline_mode<synchronous>, transform_indices = @transform_17, window_bounds = array<i64: 1, 128>}, {transform_indices = @transform_18, window_bounds = array<i64: 1, 16, 128>}]} {
    %c0 = arith.constant 0 : index
    %c0_0 = arith.constant 0 : index
    %c0_1 = arith.constant 0 : index
    %0 = vector.load %arg2[%c0, %c0_0, %c0_1] : memref<1x16x128xf32, #tpu.memory_space<vmem>>, vector<1x16x128xf32>
    %1 = vector.shape_cast %0 : vector<1x16x128xf32> to vector<16x128xf32>
    %c0_2 = arith.constant 0 : index
    %c0_3 = arith.constant 0 : index
    %c0_4 = arith.constant 0 : index
    %2 = vector.load %arg3[%c0_2, %c0_3, %c0_4] : memref<1x16x8xf32, #tpu.memory_space<vmem>>, vector<1x16x8xf32>
    %3 = vector.shape_cast %2 : vector<1x16x8xf32> to vector<16x8xf32>
    %c0_5 = arith.constant 0 : index
    %c0_6 = arith.constant 0 : index
    %c0_7 = arith.constant 0 : index
    %4 = vector.load %arg4[%c0_5, %c0_6, %c0_7] : memref<1x1x128xf32, #tpu.memory_space<vmem>>, vector<1x1x128xf32>
    %5 = vector.shape_cast %4 : vector<1x1x128xf32> to vector<1x128xf32>
    %c0_8 = arith.constant 0 : index
    %c0_9 = arith.constant 0 : index
    %c0_10 = arith.constant 0 : index
    %6 = vector.load %arg5[%c0_8, %c0_9, %c0_10] : memref<1x128x128xf32, #tpu.memory_space<vmem>>, vector<1x128x128xf32>
    %7 = vector.shape_cast %6 : vector<1x128x128xf32> to vector<128x128xf32>
    %c0_11 = arith.constant 0 : index
    %c0_12 = arith.constant 0 : index
    %8 = vector.load %arg6[%c0_11, %c0_12] : memref<128x128xf32, #tpu.memory_space<vmem>>, vector<128x128xf32>
    %c0_13 = arith.constant 0 : index
    %c0_14 = arith.constant 0 : index
    %9 = vector.load %arg7[%c0_13, %c0_14] : memref<8x128xf32, #tpu.memory_space<vmem>>, vector<8x128xf32>
    %c0_15 = arith.constant 0 : index
    %c0_16 = arith.constant 0 : index
    %10 = vector.load %arg8[%c0_15, %c0_16] : memref<1x128xf32, #tpu.memory_space<vmem>>, vector<1x128xf32>
    %c0_17 = arith.constant 0 : index
    %c0_18 = arith.constant 0 : index
    %11 = vector.load %arg9[%c0_17, %c0_18] : memref<128x128xbf16, #tpu.memory_space<vmem>>, vector<128x128xbf16>
    %c0_19 = arith.constant 0 : index
    %c0_20 = arith.constant 0 : index
    %12 = vector.load %arg10[%c0_19, %c0_20] : memref<1x128xf32, #tpu.memory_space<vmem>>, vector<1x128xf32>
    %cst = arith.constant dense<0.000000e+00> : vector<16x128xf32>
    %13 = tpu.matmul %3, %9, %cst {dimension_numbers = #tpu.dot_dimension_numbers<[1], [0], [0], [1], [0, 0, 1, 1], [], []>} : vector<16x8xf32>, vector<8x128xf32>, vector<16x128xf32> -> vector<16x128xf32>
    %14 = vector.broadcast %10 : vector<1x128xf32> to vector<16x128xf32>
    %15 = arith.addf %13, %14 : vector<16x128xf32>
    %cst_21 = arith.constant 0.000000e+00 : f32
    %16 = vector.broadcast %cst_21 : f32 to vector<16x128xf32>
    %17 = arith.maximumf %15, %16 : vector<16x128xf32>
    %18 = arith.truncf %17 : vector<16x128xf32> to vector<16x128xbf16>
    %cst_22 = arith.constant dense<0.000000e+00> : vector<16x128xf32>
    %19 = tpu.matmul %18, %11, %cst_22 {dimension_numbers = #tpu.dot_dimension_numbers<[1], [0], [0], [1], [0, 0, 1, 1], [], []>} : vector<16x128xbf16>, vector<128x128xbf16>, vector<16x128xf32> -> vector<16x128xf32>
    %20 = vector.broadcast %12 : vector<1x128xf32> to vector<16x128xf32>
    %21 = arith.addf %19, %20 : vector<16x128xf32>
    %22 = arith.addf %1, %21 : vector<16x128xf32>
    %23 = arith.truncf %22 : vector<16x128xf32> to vector<16x128xbf16>
    %c0_23 = arith.constant 0 : index
    %c0_24 = arith.constant 0 : index
    %24 = vector.load %arg11[%c0_23, %c0_24] : memref<128x128xbf16, #tpu.memory_space<vmem>>, vector<128x128xbf16>
    %cst_25 = arith.constant dense<0.000000e+00> : vector<16x128xf32>
    %25 = tpu.matmul %23, %24, %cst_25 {dimension_numbers = #tpu.dot_dimension_numbers<[1], [0], [0], [1], [0, 0, 1, 1], [], []>} : vector<16x128xbf16>, vector<128x128xbf16>, vector<16x128xf32> -> vector<16x128xf32>
    %cst_26 = arith.constant 0.000000e+00 : f32
    %26 = vector.broadcast %cst_26 : f32 to vector<16x128xf32>
    %27 = arith.cmpf ogt, %25, %26 : vector<16x128xf32>
    %cst_27 = arith.constant 1.000000e+00 : f32
    %28 = vector.broadcast %cst_27 : f32 to vector<16x128xf32>
    %29 = arith.addf %25, %28 : vector<16x128xf32>
    %cst_28 = arith.constant 0.000000e+00 : f32
    %30 = vector.broadcast %cst_28 : f32 to vector<16x128xf32>
    %31 = arith.minimumf %25, %30 : vector<16x128xf32>
    %32 = math.exp %31 : vector<16x128xf32>
    %33 = arith.select %27, %29, %32 : vector<16x128xi1>, vector<16x128xf32>
    %34 = arith.mulf %7, %8 : vector<128x128xf32>
    %35 = arith.truncf %34 : vector<128x128xf32> to vector<128x128xbf16>
    %36 = arith.truncf %33 : vector<16x128xf32> to vector<16x128xbf16>
    %cst_29 = arith.constant dense<0.000000e+00> : vector<16x128xf32>
    %37 = tpu.matmul %36, %35, %cst_29 {dimension_numbers = #tpu.dot_dimension_numbers<[1], [0], [0], [1], [0, 0, 1, 1], [], []>} : vector<16x128xbf16>, vector<128x128xbf16>, vector<16x128xf32> -> vector<16x128xf32>
    %38 = vector.broadcast %5 : vector<1x128xf32> to vector<16x128xf32>
    %39 = arith.mulf %33, %38 : vector<16x128xf32>
    %cst_30 = arith.constant dense<0.000000e+00> : vector<16x128xf32>
    %40 = tpu.matmul %39, %8, %cst_30 {dimension_numbers = #tpu.dot_dimension_numbers<[1], [0], [0], [1], [0, 0, 1, 1], [], []>} : vector<16x128xf32>, vector<128x128xf32>, vector<16x128xf32> -> vector<16x128xf32>
    %cst_31 = arith.constant 9.99999997E-7 : f32
    %41 = vector.broadcast %cst_31 : f32 to vector<16x128xf32>
    %42 = arith.addf %40, %41 : vector<16x128xf32>
    %43 = tpu.reciprocal %42 {approx = true} : vector<16x128xf32> -> vector<16x128xf32>
    %44 = arith.mulf %37, %43 : vector<16x128xf32>
    %cst_32 = arith.constant 1.600000e+01 : f32
    %45 = vector.broadcast %cst_32 : f32 to vector<16x128xf32>
    %46 = arith.mulf %44, %45 : vector<16x128xf32>
    %47 = arith.truncf %46 : vector<16x128xf32> to vector<16x128xbf16>
    %c0_33 = arith.constant 0 : index
    %c0_34 = arith.constant 0 : index
    %48 = vector.load %arg12[%c0_33, %c0_34] : memref<128x128xbf16, #tpu.memory_space<vmem>>, vector<128x128xbf16>
    %cst_35 = arith.constant dense<0.000000e+00> : vector<16x128xf32>
    %49 = tpu.matmul %47, %48, %cst_35 {dimension_numbers = #tpu.dot_dimension_numbers<[1], [0], [0], [1], [0, 0, 1, 1], [], []>} : vector<16x128xbf16>, vector<128x128xbf16>, vector<16x128xf32> -> vector<16x128xf32>
    %c0_36 = arith.constant 0 : index
    %c0_37 = arith.constant 0 : index
    %50 = vector.load %arg13[%c0_36, %c0_37] : memref<1x128xf32, #tpu.memory_space<vmem>>, vector<1x128xf32>
    %c0_38 = arith.constant 0 : index
    %c0_39 = arith.constant 0 : index
    %51 = vector.load %arg14[%c0_38, %c0_39] : memref<1x128xf32, #tpu.memory_space<vmem>>, vector<1x128xf32>
    %cst_40 = arith.constant dense<0.000000e+00> : vector<16xf32>
    %52 = vector.multi_reduction <add>, %49, %cst_40 [1] : vector<16x128xf32> to vector<16xf32>
    %53 = vector.shape_cast %52 : vector<16xf32> to vector<16x1xf32>
    %cst_41 = arith.constant 3.125000e-02 : f32
    %54 = vector.broadcast %cst_41 : f32 to vector<16x1xf32>
    %55 = arith.mulf %53, %54 : vector<16x1xf32>
    %56 = vector.broadcast %55 : vector<16x1xf32> to vector<16x128xf32>
    %57 = arith.subf %49, %56 : vector<16x128xf32>
    %58 = arith.mulf %57, %57 : vector<16x128xf32>
    %cst_42 = arith.constant dense<0.000000e+00> : vector<16xf32>
    %59 = vector.multi_reduction <add>, %58, %cst_42 [1] : vector<16x128xf32> to vector<16xf32>
    %60 = vector.shape_cast %59 : vector<16xf32> to vector<16x1xf32>
    %cst_43 = arith.constant 9.600000e+01 : f32
    %61 = vector.broadcast %cst_43 : f32 to vector<16x1xf32>
    %62 = arith.mulf %61, %55 : vector<16x1xf32>
    %63 = arith.mulf %62, %55 : vector<16x1xf32>
    %64 = arith.subf %60, %63 : vector<16x1xf32>
    %cst_44 = arith.constant 3.125000e-02 : f32
    %65 = vector.broadcast %cst_44 : f32 to vector<16x1xf32>
    %66 = arith.mulf %64, %65 : vector<16x1xf32>
    %cst_45 = arith.constant 0.000000e+00 : f32
    %67 = vector.broadcast %cst_45 : f32 to vector<16x1xf32>
    %68 = arith.maximumf %66, %67 : vector<16x1xf32>
    %cst_46 = arith.constant 9.99999974E-6 : f32
    %69 = vector.broadcast %cst_46 : f32 to vector<16x1xf32>
    %70 = arith.addf %68, %69 : vector<16x1xf32>
    %71 = math.rsqrt %70 : vector<16x1xf32>
    %72 = vector.broadcast %71 : vector<16x1xf32> to vector<16x128xf32>
    %73 = arith.mulf %57, %72 : vector<16x128xf32>
    %74 = vector.broadcast %50 : vector<1x128xf32> to vector<16x128xf32>
    %75 = arith.mulf %73, %74 : vector<16x128xf32>
    %76 = vector.broadcast %51 : vector<1x128xf32> to vector<16x128xf32>
    %77 = arith.addf %75, %76 : vector<16x128xf32>
    %78 = arith.truncf %1 : vector<16x128xf32> to vector<16x128xbf16>
    %c0_47 = arith.constant 0 : index
    %c0_48 = arith.constant 0 : index
    %79 = vector.load %arg15[%c0_47, %c0_48] : memref<128x256xbf16, #tpu.memory_space<vmem>>, vector<128x256xbf16>
    %cst_49 = arith.constant dense<0.000000e+00> : vector<16x256xf32>
    %80 = tpu.matmul %78, %79, %cst_49 {dimension_numbers = #tpu.dot_dimension_numbers<[1], [0], [0], [1], [0, 0, 1, 1], [], []>} : vector<16x128xbf16>, vector<128x256xbf16>, vector<16x256xf32> -> vector<16x256xf32>
    %81 = arith.truncf %77 : vector<16x128xf32> to vector<16x128xbf16>
    %c0_50 = arith.constant 0 : index
    %c0_51 = arith.constant 0 : index
    %82 = vector.load %arg16[%c0_50, %c0_51] : memref<128x256xbf16, #tpu.memory_space<vmem>>, vector<128x256xbf16>
    %cst_52 = arith.constant dense<0.000000e+00> : vector<16x256xf32>
    %83 = tpu.matmul %81, %82, %cst_52 {dimension_numbers = #tpu.dot_dimension_numbers<[1], [0], [0], [1], [0, 0, 1, 1], [], []>} : vector<16x128xbf16>, vector<128x256xbf16>, vector<16x256xf32> -> vector<16x256xf32>
    %84 = arith.addf %80, %83 : vector<16x256xf32>
    %cst_53 = arith.constant 0.000000e+00 : f32
    %85 = vector.broadcast %cst_53 : f32 to vector<16x256xf32>
    %86 = arith.maximumf %84, %85 : vector<16x256xf32>
    %87 = arith.truncf %86 : vector<16x256xf32> to vector<16x256xbf16>
    %c0_54 = arith.constant 0 : index
    %c0_55 = arith.constant 0 : index
    %88 = vector.load %arg17[%c0_54, %c0_55] : memref<256x128xbf16, #tpu.memory_space<vmem>>, vector<256x128xbf16>
    %cst_56 = arith.constant dense<0.000000e+00> : vector<16x128xf32>
    %89 = tpu.matmul %87, %88, %cst_56 {dimension_numbers = #tpu.dot_dimension_numbers<[1], [0], [0], [1], [0, 0, 1, 1], [], []>} : vector<16x256xbf16>, vector<256x128xbf16>, vector<16x128xf32> -> vector<16x128xf32>
    %c0_57 = arith.constant 0 : index
    %c0_58 = arith.constant 0 : index
    %90 = vector.load %arg18[%c0_57, %c0_58] : memref<1x128xf32, #tpu.memory_space<vmem>>, vector<1x128xf32>
    %c0_59 = arith.constant 0 : index
    %c0_60 = arith.constant 0 : index
    %91 = vector.load %arg19[%c0_59, %c0_60] : memref<1x128xf32, #tpu.memory_space<vmem>>, vector<1x128xf32>
    %cst_61 = arith.constant dense<0.000000e+00> : vector<16xf32>
    %92 = vector.multi_reduction <add>, %89, %cst_61 [1] : vector<16x128xf32> to vector<16xf32>
    %93 = vector.shape_cast %92 : vector<16xf32> to vector<16x1xf32>
    %cst_62 = arith.constant 3.125000e-02 : f32
    %94 = vector.broadcast %cst_62 : f32 to vector<16x1xf32>
    %95 = arith.mulf %93, %94 : vector<16x1xf32>
    %96 = vector.broadcast %95 : vector<16x1xf32> to vector<16x128xf32>
    %97 = arith.subf %89, %96 : vector<16x128xf32>
    %98 = arith.mulf %97, %97 : vector<16x128xf32>
    %cst_63 = arith.constant dense<0.000000e+00> : vector<16xf32>
    %99 = vector.multi_reduction <add>, %98, %cst_63 [1] : vector<16x128xf32> to vector<16xf32>
    %100 = vector.shape_cast %99 : vector<16xf32> to vector<16x1xf32>
    %cst_64 = arith.constant 9.600000e+01 : f32
    %101 = vector.broadcast %cst_64 : f32 to vector<16x1xf32>
    %102 = arith.mulf %101, %95 : vector<16x1xf32>
    %103 = arith.mulf %102, %95 : vector<16x1xf32>
    %104 = arith.subf %100, %103 : vector<16x1xf32>
    %cst_65 = arith.constant 3.125000e-02 : f32
    %105 = vector.broadcast %cst_65 : f32 to vector<16x1xf32>
    %106 = arith.mulf %104, %105 : vector<16x1xf32>
    %cst_66 = arith.constant 0.000000e+00 : f32
    %107 = vector.broadcast %cst_66 : f32 to vector<16x1xf32>
    %108 = arith.maximumf %106, %107 : vector<16x1xf32>
    %cst_67 = arith.constant 9.99999974E-6 : f32
    %109 = vector.broadcast %cst_67 : f32 to vector<16x1xf32>
    %110 = arith.addf %108, %109 : vector<16x1xf32>
    %111 = math.rsqrt %110 : vector<16x1xf32>
    %112 = vector.broadcast %111 : vector<16x1xf32> to vector<16x128xf32>
    %113 = arith.mulf %97, %112 : vector<16x128xf32>
    %114 = vector.broadcast %90 : vector<1x128xf32> to vector<16x128xf32>
    %115 = arith.mulf %113, %114 : vector<16x128xf32>
    %116 = vector.broadcast %91 : vector<1x128xf32> to vector<16x128xf32>
    %117 = arith.addf %115, %116 : vector<16x128xf32>
    %118 = arith.addf %1, %117 : vector<16x128xf32>
    %c0_68 = arith.constant 0 : index
    %c0_69 = arith.constant 0 : index
    %c0_70 = arith.constant 0 : index
    %119 = vector.load %arg20[%c0_68, %c0_69, %c0_70] : memref<1x16x128xf32, #tpu.memory_space<vmem>>, vector<1x16x128xf32>
    %120 = vector.shape_cast %119 : vector<1x16x128xf32> to vector<16x128xf32>
    %121 = vector.shape_cast %118 : vector<16x128xf32> to vector<1x16x128xf32>
    tpu.vector_store %arg20[%c0_68, %c0_69, %c0_70], %121 {strides = array<i32>} : memref<1x16x128xf32, #tpu.memory_space<vmem>>, vector<1x16x128xf32>,
    return
  }
  func.func @transform_0(%arg0: i32, %arg1: i32) -> (i32, i32, i32) {
    %c0_i32 = arith.constant 0 : i32
    %c0_i32_0 = arith.constant 0 : i32
    return %arg0, %arg1, %c0_i32 : i32, i32, i32
  }
  func.func @transform_1(%arg0: i32, %arg1: i32) -> (i32, i32, i32) {
    %c0_i32 = arith.constant 0 : i32
    %c0_i32_0 = arith.constant 0 : i32
    return %arg0, %arg1, %c0_i32 : i32, i32, i32
  }
  func.func @transform_2(%arg0: i32, %arg1: i32) -> (i32, i32, i32) {
    %c0_i32 = arith.constant 0 : i32
    %c0_i32_0 = arith.constant 0 : i32
    %c0_i32_1 = arith.constant 0 : i32
    return %arg0, %c0_i32, %c0_i32_0 : i32, i32, i32
  }
  func.func @transform_3(%arg0: i32, %arg1: i32) -> (i32, i32, i32) {
    %c0_i32 = arith.constant 0 : i32
    %c0_i32_0 = arith.constant 0 : i32
    %c0_i32_1 = arith.constant 0 : i32
    return %arg0, %c0_i32, %c0_i32_0 : i32, i32, i32
  }
  func.func @transform_4(%arg0: i32, %arg1: i32) -> (i32, i32) {
    %c0_i32 = arith.constant 0 : i32
    %c0_i32_0 = arith.constant 0 : i32
    %c0_i32_1 = arith.constant 0 : i32
    return %c0_i32, %c0_i32_0 : i32, i32
  }
  func.func @transform_5(%arg0: i32, %arg1: i32) -> (i32, i32) {
    %c0_i32 = arith.constant 0 : i32
    %c0_i32_0 = arith.constant 0 : i32
    %c0_i32_1 = arith.constant 0 : i32
    return %c0_i32, %c0_i32_0 : i32, i32
  }
  func.func @transform_6(%arg0: i32, %arg1: i32) -> (i32, i32) {
    %c0_i32 = arith.constant 0 : i32
    %c0_i32_0 = arith.constant 0 : i32
    %c0_i32_1 = arith.constant 0 : i32
    return %c0_i32, %c0_i32_0 : i32, i32
  }
  func.func @transform_7(%arg0: i32, %arg1: i32) -> (i32, i32) {
    %c0_i32 = arith.constant 0 : i32
    %c0_i32_0 = arith.constant 0 : i32
    %c0_i32_1 = arith.constant 0 : i32
    return %c0_i32, %c0_i32_0 : i32, i32
  }
  func.func @transform_8(%arg0: i32, %arg1: i32) -> (i32, i32) {
    %c0_i32 = arith.constant 0 : i32
    %c0_i32_0 = arith.constant 0 : i32
    %c0_i32_1 = arith.constant 0 : i32
    return %c0_i32, %c0_i32_0 : i32, i32
  }
  func.func @transform_9(%arg0: i32, %arg1: i32) -> (i32, i32) {
    %c0_i32 = arith.constant 0 : i32
    %c0_i32_0 = arith.constant 0 : i32
    %c0_i32_1 = arith.constant 0 : i32
    return %c0_i32, %c0_i32_0 : i32, i32
  }
  func.func @transform_10(%arg0: i32, %arg1: i32) -> (i32, i32) {
    %c0_i32 = arith.constant 0 : i32
    %c0_i32_0 = arith.constant 0 : i32
    %c0_i32_1 = arith.constant 0 : i32
    return %c0_i32, %c0_i32_0 : i32, i32
  }
  func.func @transform_11(%arg0: i32, %arg1: i32) -> (i32, i32) {
    %c0_i32 = arith.constant 0 : i32
    %c0_i32_0 = arith.constant 0 : i32
    %c0_i32_1 = arith.constant 0 : i32
    return %c0_i32, %c0_i32_0 : i32, i32
  }
  func.func @transform_12(%arg0: i32, %arg1: i32) -> (i32, i32) {
    %c0_i32 = arith.constant 0 : i32
    %c0_i32_0 = arith.constant 0 : i32
    %c0_i32_1 = arith.constant 0 : i32
    return %c0_i32, %c0_i32_0 : i32, i32
  }
  func.func @transform_13(%arg0: i32, %arg1: i32) -> (i32, i32) {
    %c0_i32 = arith.constant 0 : i32
    %c0_i32_0 = arith.constant 0 : i32
    %c0_i32_1 = arith.constant 0 : i32
    return %c0_i32, %c0_i32_0 : i32, i32
  }
  func.func @transform_14(%arg0: i32, %arg1: i32) -> (i32, i32) {
    %c0_i32 = arith.constant 0 : i32
    %c0_i32_0 = arith.constant 0 : i32
    %c0_i32_1 = arith.constant 0 : i32
    return %c0_i32, %c0_i32_0 : i32, i32
  }
  func.func @transform_15(%arg0: i32, %arg1: i32) -> (i32, i32) {
    %c0_i32 = arith.constant 0 : i32
    %c0_i32_0 = arith.constant 0 : i32
    %c0_i32_1 = arith.constant 0 : i32
    return %c0_i32, %c0_i32_0 : i32, i32
  }
  func.func @transform_16(%arg0: i32, %arg1: i32) -> (i32, i32) {
    %c0_i32 = arith.constant 0 : i32
    %c0_i32_0 = arith.constant 0 : i32
    %c0_i32_1 = arith.constant 0 : i32
    return %c0_i32, %c0_i32_0 : i32, i32
  }
  func.func @transform_17(%arg0: i32, %arg1: i32) -> (i32, i32) {
    %c0_i32 = arith.constant 0 : i32
    %c0_i32_0 = arith.constant 0 : i32
    %c0_i32_1 = arith.constant 0 : i32
    return %c0_i32, %c0_i32_0 : i32, i32
  }
  func.func @transform_18(%arg0: i32, %arg1: i32) -> (i32, i32, i32) {
    %c0_i32 = arith.constant 0 : i32
    %c0_i32_0 = arith.constant 0 : i32
    return %arg0, %arg1, %c0_i32 : i32, i32, i32
  }
}

</mosaic_0001>

<bundles_post_ra>
// kernel: self_attention_forward.2
= control target key start
LH: loop header
LB: loop body
LE: loop exit
PB: predicated region body
PF: predicated region fallthrough
CT: control target
= control target key end

     0   :  { %s1483_s30 = smov 0   ;;  %s1485_s10 = smov 0   ;;  %s1668_s0 = inlined_call_operand.vmem [shape: f32[2,16,128], index: 0, kind: input, shape index: {}]   ;;  %s1669_s1 = inlined_call_operand.vmem [shape: f32[2,16,8], index: 1, kind: input, shape index: {}]   ;;  %s1670_s2 = inlined_call_operand.vmem [shape: f32[8,128], index: 2, kind: input, shape index: {}]   ;;  %s1671_s3 = inlined_call_operand.vmem [shape: f32[1,128], index: 3, kind: input, shape index: {}]   ;;  %s1672_s4 = inlined_call_operand.vmem [shape: bf16[128,128], index: 4, kind: input, shape index: {}]   ;;  %s1673_s5 = inlined_call_operand.vmem [shape: f32[1,128], index: 5, kind: input, shape index: {}]   ;;  %s1674_s6 = inlined_call_operand.vmem [shape: bf16[128,128], index: 6, kind: input, shape index: {}]   ;;  %s1675_s7 = inlined_call_operand.vmem [shape: bf16[128,128], index: 7, kind: input, shape index: {}]   ;;  %s1676_s8 = inlined_call_operand.vmem [shape: f32[2,1,128], index: 8, kind: output, shape index: {0}]   ;;  %s1677_s9 = inlined_call_operand.vmem [shape: f32[2,128,128], index: 9, kind: output, shape index: {1}]  }
   0x1   :  { %s1487_s11 = smov 0  }
   0x2 LB: > { %s32_s12 = sadd.s32 1, %s1425_s10  ;;  %p1182_p0 = scmp.ge.s32.totalorder %s1429_s11, 1  ;;  %s1429_s11 = sphi %s1487_s11, %s20_s11   ;;  %s1425_s10 = sphi %s1485_s10, %s1679_s10   ;;  %s1421_s30 = sphi %s1483_s30, %s1678_s30  }
   0x3   : > { %p34_p1 = scmp.ge.s32.totalorder %s32_s12, 2  ;;  %p326_p2 = scmp.lt.s32.totalorder %s1429_s11, 3 }
   0x5   : > { %s1681_s12 = smov (%p34_p1, %s32_s12), 0  ;;  %p327_p3 = pnand %p1182_p0, %p326_p2 }
   0x6   : > { %v411_v0 = vld [vmem:[%s1670_s2] sm:$0xff] (!%p327_p3)  ;;  %p379_p4 = scmp.lt.s32.totalorder (!%p327_p3), %s1421_s30, 1  ;;  %v1431_v1 = vmov (!%p327_p3), 0.0   ;;  %v1380_v3 = vld [vmem:[%s1672_s4 + $0x8] sm:$0xff] (!%p327_p3)   ;;  %vm436_vm0 = vcmask (!%p327_p3), 64512   ;;  %v1381_v6 = vld [vmem:[%s1672_s4 + $0x10] sm:$0xff] (!%p327_p3)  }
   0x7   : > { %330 = sbr.rel (%p327_p3) target bundleno = 1037 (0x40d), region = 52  ;;  %1269 = vmatprep.subr.mxu0 (!%p327_p3), %v411_v0  ;;  %1274 = vmatprep.subr.bf16.mxu1 (!%p327_p3), %v1431_v1  ;;  %v1379_v2 = vld [vmem:[%s1672_s4] sm:$0xff] (!%p327_p3)   ;;  %v1382_v7 = vld [vmem:[%s1672_s4 + $0x18] sm:$0xff] (!%p327_p3)   ;;  %v1384_v9 = vld [vmem:[%s1672_s4 + $0x28] sm:$0xff] (!%p327_p3)   ;;  %vm1432_vm1 = vmmov (!%p327_p3), 0   ;;  %vm861_vm4 = vcmask (!%p327_p3), 130048  }
   0x8   : > { %1270 = vmatpush3.msra.mxu0 (!%p327_p3), %v411_v0  ;;  %1275 = vmatpush3.bf16.msra.mxu1 (!%p327_p3), %v1379_v2  ;;  %v1383_v8 = vld [vmem:[%s1672_s4 + $0x20] sm:$0xff] (!%p327_p3)   ;;  %v1385_v10 = vld [vmem:[%s1672_s4 + $0x30] sm:$0xff] (!%p327_p3)   ;;  %v1386_v11 = vld [vmem:[%s1672_s4 + $0x38] sm:$0xff] (!%p327_p3)  }
   0x9   : > { %1294 = vmatprep.subr.bf16.mxu0 (!%p327_p3), %v1431_v1  ;;  %1276 = vmatprep.subr.bf16.mxu1 (!%p327_p3), %v1431_v1  ;;  %v1387_v12 = vld [vmem:[%s1674_s6] sm:$0xff] (!%p327_p3)   ;;  %v1389_v13 = vld [vmem:[%s1674_s6 + $0x8] sm:$0xff] (!%p327_p3)   ;;  %v1391_v14 = vld [vmem:[%s1674_s6 + $0x10] sm:$0xff] (!%p327_p3)  }
   0xa   : > { %1290 = vmatprep.mubr.msk.bf16.mxu1 (!%p327_p3), %vm1432_vm1, %v1431_v1  ;;  %v1393_v15 = vld [vmem:[%s1674_s6 + $0x18] sm:$0xff] (!%p327_p3)   ;;  %v1395_v16 = vld [vmem:[%s1674_s6 + $0x20] sm:$0xff] (!%p327_p3)   ;;  %v1397_v17 = vld [vmem:[%s1674_s6 + $0x28] sm:$0xff] (!%p327_p3)  }
   0xb   : > { %v1189_v18 = vld [vmem:[%s1671_s3] ss:$0 sm:$0xff] (!%p327_p3)  ;;  %v1390_v27 = vld [vmem:[%s1675_s7 + $0x8] sm:$0xff] (!%p327_p3)   ;;  %v1392_v28 = vld [vmem:[%s1675_s7 + $0x10] sm:$0xff] (!%p327_p3)  }
   0xc   : > { %1277 = vmatpush3.bf16.msra.mxu1 (!%p327_p3), %v1380_v3  ;;  %v1388_v25 = vld [vmem:[%s1675_s7] sm:$0xff] (!%p327_p3)   ;;  %v1394_v29 = vld [vmem:[%s1675_s7 + $0x18] sm:$0xff] (!%p327_p3)   ;;  %v1398_v31 = vld [vmem:[%s1675_s7 + $0x28] sm:$0xff] (!%p327_p3)  }
   0xd   : > { %1278 = vmatprep.subr.bf16.mxu1 (!%p327_p3), %v1431_v1  ;;  %v1396_v30 = vld [vmem:[%s1675_s7 + $0x20] sm:$0xff] (!%p327_p3)   ;;  %v1399_v32 = vld [vmem:[%s1674_s6 + $0x30] sm:$0xff] (!%p327_p3)   ;;  %v1401_v34 = vld [vmem:[%s1674_s6 + $0x38] sm:$0xff] (!%p327_p3)  }
   0xe   : > { %s1683_s30 = smov (!%p379_p4, %s1421_s30), 1  ;;  %v1400_v33 = vld [vmem:[%s1675_s7 + $0x30] sm:$0xff]   ;;  %v1402_v35 = vld [vmem:[%s1675_s7 + $0x38] sm:$0xff]   ;;  %v1192_v36 = vld [vmem:[%s1673_s5] ss:$0 sm:$0xff] }
   0xf   : > { %s1227_s19 = sshll.u32 %s1683_s30, 4  ;;  %s400_s27 = scalar_lea.vmem %s1676_s8, %s1683_s30 }
  0x10   : > { %s396_s22 = scalar_lea.vmem %s1669_s1, %s1227_s19  ;;  %1279 = vmatpush3.bf16.msra.mxu1 %v1381_v6  ;;  %s386_s23 = scalar_lea.vmem %s1668_s0, %s1227_s19 }
  0x11   : > { %v409_v4 = vld [vmem:[%s396_s22] sm:$0xff]  ;;  %v410_v5 = vld [vmem:[%s396_s22 + $0x8] sm:$0xff]  ;;  %1280 = vmatprep.subr.bf16.mxu1 %v1431_v1  ;;  %s1229_s28 = sshll.u32 %s1683_s30, 7 }
  0x12   : > { %1271 = vmatprep.mubr.msk.f32.mxu0 %vm436_vm0, %v409_v4  ;;  %v407_v37 = vld [vmem:[%s386_s23] sm:$0xff]  ;;  %v408_v41 = vld [vmem:[%s386_s23 + $0x8] sm:$0xff]  ;;  %s1641_s14 = scalar_lea.vmem %s1677_s9, %s1229_s28 }
  0x13   : > { %1272 = vmatmul.mubr.msk.f32.vlgmr.msra.gmra.mrb[0].mxu0 %vm436_vm0, %v410_v5 }
  0x14   : > { %1281 = vmatpush3.bf16.msra.mxu1 %v1382_v7  ;;  %1310 = vmatprep.mubr.msk.bf16.mxu0 %vm1432_vm1, %v1431_v1 }
  0x15   : > { %1282 = vmatprep.subr.bf16.mxu1 %v1431_v1  ;;  %1295 = vmatpush3.bf16.msra.mxu0 %v1387_v12 }
  0x16   : > { %1296 = vmatprep.subr.bf16.mxu0 %v1431_v1 }
  0x18   : > { %1283 = vmatpush3.bf16.msra.mxu1 %v1383_v8 }
  0x19   : > { %1284 = vmatprep.subr.bf16.mxu1 %v1431_v1  ;;  %1297 = vmatpush3.bf16.msra.mxu0 %v1389_v13 }
  0x1a   : > { %1298 = vmatprep.subr.bf16.mxu0 %v1431_v1 }
  0x1c   : > { %1285 = vmatpush3.bf16.msra.mxu1 %v1384_v9 }
  0x1d   : > { %1286 = vmatprep.subr.bf16.mxu1 %v1431_v1  ;;  %1299 = vmatpush3.bf16.msra.mxu0 %v1391_v14 }
  0x1e   : > { %1300 = vmatprep.subr.bf16.mxu0 %v1431_v1 }
  0x20   : > { %1287 = vmatpush3.bf16.msra.mxu1 %v1385_v10 }
  0x21   : > { %1288 = vmatprep.subr.bf16.mxu1 %v1431_v1  ;;  %1301 = vmatpush3.bf16.msra.mxu0 %v1393_v15 }
  0x22   : > { %1302 = vmatprep.subr.bf16.mxu0 %v1431_v1 }
  0x24   : > { %1289 = vmatpush3.bf16.msra.mxu1 %v1386_v11 }
  0x25   : > { %1314 = vmatprep.subr.bf16.mxu1 %v1431_v1  ;;  %1303 = vmatpush3.bf16.msra.mxu0 %v1395_v16 }
  0x26   : > { %1304 = vmatprep.subr.bf16.mxu0 %v1431_v1 }
  0x29   : > { %1305 = vmatpush3.bf16.msra.mxu0 %v1397_v17 }
  0x2a   : > { %1306 = vmatprep.subr.bf16.mxu0 %v1431_v1 }
  0x2d   : > { %1307 = vmatpush3.bf16.msra.mxu0 %v1399_v32 }
  0x2e   : > { %1308 = vmatprep.subr.bf16.mxu0 %v1431_v1 }
  0x31   : > { %1309 = vmatpush3.bf16.msra.mxu0 %v1401_v34 }
  0xe6   : > { %v1273_v19 = vpop.f32.mrb[0].mxu0 }
  0xe7   : > { %v515_v20 = vadd.f32 %v1273_v19, %v1189_v18  ;;  %v509_v21 = vpop.f32.mrb[1].mxu0 }
  0xe8   : > { %v510_v22 = vadd.f32 %v1189_v18, %v509_v21 }
  0xe9   : > { %v519_v23 = vmax.f32 %v515_v20, 0.0 }
  0xea   : > { %v518_v24 = vmax.f32 %v510_v22, 0.0 }
  0xec   : > { %v520_v26 = vpack.c.bf16 %v519_v23, %v518_v24 }
  0xee   : > { %1291 = vmatmul.mubr.bf16.vlgmr.msra.gmra.mrb[0].mxu1 %v520_v26 }
  0xef   : > { %1315 = vmatpush3.bf16.msra.mxu1 %v1388_v25  ;;  %1330 = vmatprep.mubr.msk.bf16.mxu1 %vm1432_vm1, %v1431_v1 }
  0xf0   : > { %1316 = vmatprep.subr.bf16.mxu1 %v1431_v1 }
  0xf3   : > { %1317 = vmatpush3.bf16.msra.mxu1 %v1390_v27 }
  0xf4   : > { %1318 = vmatprep.subr.bf16.mxu1 %v1431_v1 }
  0xf7   : > { %1319 = vmatpush3.bf16.msra.mxu1 %v1392_v28 }
  0xf8   : > { %1320 = vmatprep.subr.bf16.mxu1 %v1431_v1 }
  0xfb   : > { %1321 = vmatpush3.bf16.msra.mxu1 %v1394_v29 }
  0xfc   : > { %1322 = vmatprep.subr.bf16.mxu1 %v1431_v1 }
  0xff   : > { %1323 = vmatpush3.bf16.msra.mxu1 %v1396_v30 }
 0x100   : > { %1324 = vmatprep.subr.bf16.mxu1 %v1431_v1 }
 0x103   : > { %1325 = vmatpush3.bf16.msra.mxu1 %v1398_v31 }
 0x104   : > { %1326 = vmatprep.subr.bf16.mxu1 %v1431_v1 }
 0x107   : > { %1327 = vmatpush3.bf16.msra.mxu1 %v1400_v33 }
 0x108   : > { %1328 = vmatprep.subr.bf16.mxu1 %v1431_v1 }
 0x10b   : > { %1329 = vmatpush3.bf16.msra.mxu1 %v1402_v35 }
 0x1c1   : > { %v609_v38 = vpop.f32.mrb[0].mxu1 }
 0x1c2   : > { %v610_v39 = vadd.f32 %v1192_v36, %v609_v38  ;;  %v1292_v40 = vpop.f32.mrb[1].mxu1 }
 0x1c3   : > { %v612_v42 = vpop.f32.mrb[2].mxu1 }
 0x1c4   : > { %v616_v43 = vadd.f32 %v610_v39, %v407_v37  ;;  %v613_v44 = vadd.f32 %v1192_v36, %v612_v42  ;;  %v1293_v45 = vpop.f32.mrb[3].mxu1 }
 0x1c6   : > { %v617_v46 = vadd.f32 %v613_v44, %v408_v41 }
 0x1c8   : > { %v618_v47 = vpack.c.bf16 %v617_v46, %v616_v43 }
 0x1ca   : > { %1311 = vmatmul.mubr.bf16.vlgmr.msra.gmra.mrb[4].mxu0 %v618_v47  ;;  %1331 = vmatmul.mubr.bf16.vlgmr.msra.gmra.mrb[4].mxu1 %v618_v47 }
 0x29d   : > { %v717_v48 = vpop.f32.mrb[4].mxu0  ;;  %v822_v49 = vpop.f32.mrb[4].mxu1 }
 0x29e   : > { %v833_v50 = vmin.f32 %v717_v48, 0.0  ;;  %v1312_v51 = vpop.f32.mrb[5].mxu0  ;;  %v1332_v52 = vpop.f32.mrb[5].mxu1  ;;  %v841_v56 = vmul.f32 0.0625, %v822_v49  ;;  %v831_v0 = vadd.f32 1.0, %v717_v48  ;;  %vm829_vm2 = vcmp.gt.f32.partialorder %v717_v48, 0.0 }
 0x29f   : > { %v720_v53 = vpop.f32.mrb[6].mxu0  ;;  %v825_v54 = vpop.f32.mrb[6].mxu1 }
 0x2a0   : > { %v835_v55 = vmul.f32 1.442695, %v833_v50  ;;  %v834_v57 = vmin.f32 %v720_v53, 0.0  ;;  %v842_v58 = vmul.f32 0.0625, %v825_v54  ;;  %v1313_v59 = vpop.f32.mrb[7].mxu0  ;;  %v1333_v60 = vpop.f32.mrb[7].mxu1 }
 0x2a1   : > { %v832_v1 = vadd.f32 1.0, %v720_v53  ;;  %vm830_vm3 = vcmp.gt.f32.partialorder %v720_v53, 0.0 }
 0x2a2   : > { %1403 = vpow2.f32 %v835_v55  ;;  %v837_v61 = vmul.f32 1.442695, %v834_v57  ;;  %v843_v62 = vpack.c.bf16 %v842_v58, %v841_v56 }
 0x2a4   : > { %1405 = vpow2.f32 %v837_v61  ;;  %1334 = vmatprep.subr.bf16.mxu0 %v843_v62 }
 0x2a5   : > { %1335 = vmatpush3.bf16.msra.mxu0 %v843_v62 }
 0x2ac   : > { %v1404_v63 = vpop.eup %1403 }
 0x2ad   : > { %v839_v3 = vsel %vm829_vm2, %v831_v0, %v1404_v63 }
 0x2ae   : > { %v1406_v2 = vpop.eup %1405 }
 0x2af   : > { %v840_v4 = vsel %vm830_vm3, %v832_v1, %v1406_v2 }
 0x2b0   : > { %v844_v5 = vpack.c.bf16 %v840_v4, %v839_v3  ;;  %v983_v6 = vadd.f32 %v840_v4, %v839_v3 }
 0x2b2   : > { %v984_v7 = vrot.slane %v983_v6, 4  ;;  %845 = vxpose.xlu0.c.b16.start.end [1/1] (short) %v844_v5, 128 }
 0x2b4   : > { %v985_v8 = vadd.f32 %v984_v7, %v983_v6 }
 0x2b6   : > { %v986_v9 = vrot.slane %v985_v8, 2 }
 0x2b8   : > { %v987_v10 = vadd.f32 %v986_v9, %v985_v8 }
 0x2ba   : > { %v988_v11 = vrot.slane %v987_v10, 1 }
 0x2bc   : > { %v989_v12 = vadd.f32 %v988_v11, %v987_v10 }
 0x2be   : > { %994 = vst [vmem:[%s400_s27] sm:$0x1] %v989_v12 }
 0x318   : > { %v853_v13 = vpop.trf.xlu0 }
 0x319   : > { %1336 = vmatprep.mubr.msk.bf16.mxu0 %vm861_vm4, %v853_v13 }
 0x31c   : > { %v854_v14 = vpop.trf.xlu0 }
 0x31d   : > { %1337 = vmatmul.mubr.msk.bf16.vlgmr.msra.gmra.mrb[8].mxu0 %vm861_vm4, %v854_v14 }
 0x320   : > { %v855_v15 = vpop.trf.xlu0 }
 0x321   : > { %1340 = vmatprep.mubr.msk.bf16.mxu0 %vm861_vm4, %v855_v15 }
 0x324   : > { %v856_v16 = vpop.trf.xlu0 }
 0x325   : > { %1341 = vmatmul.mubr.msk.bf16.gmra.mrb[12].mxu0 %vm861_vm4, %v856_v16 }
 0x328   : > { %v857_v17 = vpop.trf.xlu0 }
 0x329   : > { %1344 = vmatprep.mubr.msk.bf16.mxu0 %vm861_vm4, %v857_v17 }
 0x32c   : > { %v858_v18 = vpop.trf.xlu0 }
 0x32d   : > { %1345 = vmatmul.mubr.msk.bf16.gmra.mrb[16].mxu0 %vm861_vm4, %v858_v18 }
 0x330   : > { %v859_v19 = vpop.trf.xlu0 }
 0x331   : > { %1348 = vmatprep.mubr.msk.bf16.mxu0 %vm861_vm4, %v859_v19 }
 0x334   : > { %v860_v20 = vpop.trf.xlu0 }
 0x335   : > { %1349 = vmatmul.mubr.msk.bf16.gmra.mrb[20].mxu0 %vm861_vm4, %v860_v20 }
 0x3f0   : > { %v1338_v21 = vpop.f32.mrb[8].mxu0 }
 0x3f1   : > { %997 = vst [vmem:[%s1641_s14 + $0x10] sm:$0xff] %v1338_v21  ;;  %v920_v22 = vpop.f32.mrb[9].mxu0 }
 0x3f2   : > { %995 = vst [vmem:[%s1641_s14] sm:$0xff] %v920_v22  ;;  %v1339_v23 = vpop.f32.mrb[10].mxu0 }
 0x3f3   : > { %998 = vst [vmem:[%s1641_s14 + $0x18] sm:$0xff] %v1339_v23  ;;  %v923_v24 = vpop.f32.mrb[11].mxu0 }
 0x3f4   : > { %996 = vst [vmem:[%s1641_s14 + $0x8] sm:$0xff] %v923_v24 }
 0x3f8   : > { %v1342_v25 = vpop.f32.mrb[12].mxu0 }
 0x3f9   : > { %1001 = vst [vmem:[%s1641_s14 + $0x30] sm:$0xff] %v1342_v25  ;;  %v936_v26 = vpop.f32.mrb[13].mxu0 }
 0x3fa   : > { %999 = vst [vmem:[%s1641_s14 + $0x20] sm:$0xff] %v936_v26  ;;  %v1343_v27 = vpop.f32.mrb[14].mxu0 }
 0x3fb   : > { %1002 = vst [vmem:[%s1641_s14 + $0x38] sm:$0xff] %v1343_v27  ;;  %v939_v28 = vpop.f32.mrb[15].mxu0 }
 0x3fc   : > { %1000 = vst [vmem:[%s1641_s14 + $0x28] sm:$0xff] %v939_v28 }
 0x400   : > { %v1346_v29 = vpop.f32.mrb[16].mxu0 }
 0x401   : > { %1005 = vst [vmem:[%s1641_s14 + $0x50] sm:$0xff] %v1346_v29  ;;  %v952_v30 = vpop.f32.mrb[17].mxu0 }
 0x402   : > { %1003 = vst [vmem:[%s1641_s14 + $0x40] sm:$0xff] %v952_v30  ;;  %v1347_v31 = vpop.f32.mrb[18].mxu0 }
 0x403   : > { %1006 = vst [vmem:[%s1641_s14 + $0x58] sm:$0xff] %v1347_v31  ;;  %v955_v32 = vpop.f32.mrb[19].mxu0 }
 0x404   : > { %1004 = vst [vmem:[%s1641_s14 + $0x48] sm:$0xff] %v955_v32 }
 0x408   : > { %v1350_v33 = vpop.f32.mrb[20].mxu0 }
 0x409   : > { %1009 = vst [vmem:[%s1641_s14 + $0x70] sm:$0xff] %v1350_v33  ;;  %v968_v34 = vpop.f32.mrb[21].mxu0 }
 0x40a   : > { %1007 = vst [vmem:[%s1641_s14 + $0x60] sm:$0xff] %v968_v34  ;;  %v1351_v35 = vpop.f32.mrb[22].mxu0 }
 0x40b   : > { %1010 = vst [vmem:[%s1641_s14 + $0x78] sm:$0xff] %v1351_v35  ;;  %v971_v36 = vpop.f32.mrb[23].mxu0 }
 0x40c   : > { %1008 = vst [vmem:[%s1641_s14 + $0x68] sm:$0xff] %v971_v36 }
 0x40d PF: > { %s20_s11 = sadd.s32 1, %s1429_s11   ;;  %s1678_s30 = smov %s1425_s10 }
 0x40e   : > { %p17_p5 = scmp.ge.s32.totalorder %s20_s11, 4   ;;  %s1679_s10 = smov %s1681_s12 }
 0x410   :  { %19 = sbr.rel (!%p17_p5) target bundleno = 2 (0x2), region = 105 }

// kernel: self_attention_forward.3
= control target key start
LH: loop header
LB: loop body
LE: loop exit
PB: predicated region body
PF: predicated region fallthrough
CT: control target
= control target key end

     0   :  { %s2578_s27 = smov 0   ;;  %s2580_s28 = smov 0   ;;  %s3005_s0 = inlined_call_operand.vmem [shape: f32[2,16,128], index: 0, kind: input, shape index: {}]   ;;  %s3006_s1 = inlined_call_operand.vmem [shape: f32[2,16,8], index: 1, kind: input, shape index: {}]   ;;  %s3007_s2 = inlined_call_operand.vmem [shape: f32[2,1,128], index: 2, kind: input, shape index: {}]   ;;  %s3008_s3 = inlined_call_operand.vmem [shape: f32[2,128,128], index: 3, kind: input, shape index: {}]   ;;  %s3009_s4 = inlined_call_operand.vmem [shape: f32[128,128], index: 4, kind: input, shape index: {}]   ;;  %s3010_s5 = inlined_call_operand.vmem [shape: f32[8,128], index: 5, kind: input, shape index: {}]   ;;  %s3011_s6 = inlined_call_operand.vmem [shape: f32[1,128], index: 6, kind: input, shape index: {}]   ;;  %s3012_s7 = inlined_call_operand.vmem [shape: bf16[128,128], index: 7, kind: input, shape index: {}]   ;;  %s3013_s8 = inlined_call_operand.vmem [shape: f32[1,128], index: 8, kind: input, shape index: {}]   ;;  %s3014_s9 = inlined_call_operand.vmem [shape: bf16[128,128], index: 9, kind: input, shape index: {}]   ;;  %s3015_s10 = inlined_call_operand.vmem [shape: bf16[128,128], index: 10, kind: input, shape index: {}]   ;;  %s3016_s11 = inlined_call_operand.vmem [shape: f32[1,128], index: 11, kind: input, shape index: {}]   ;;  %s3017_s12 = inlined_call_operand.vmem [shape: f32[1,128], index: 12, kind: input, shape index: {}]   ;;  %s3018_s13 = inlined_call_operand.vmem [shape: bf16[128,256], index: 13, kind: input, shape index: {}]   ;;  %s3019_s14 = inlined_call_operand.vmem [shape: bf16[128,256], index: 14, kind: input, shape index: {}]   ;;  %s3020_s15 = inlined_call_operand.vmem [shape: bf16[256,128], index: 15, kind: input, shape index: {}]   ;;  %s3021_s16 = inlined_call_operand.vmem [shape: f32[1,128], index: 16, kind: input, shape index: {}]   ;;  %s3022_s17 = inlined_call_operand.vmem [shape: f32[1,128], index: 17, kind: input, shape index: {}]   ;;  %s3023_s18 = inlined_call_operand.vmem [shape: f32[2,16,128], index: 18, kind: output, shape index: {}]  }
   0x1   :  { %3024 = sst [smem:[#allocation2_spill]] %s3005_s0  ;;  %s2582_s29 = smov 0  }
   0x2   :  { %3025 = sst [smem:[#allocation3_spill]] %s3006_s1 }
   0x3   :  { %3026 = sst [smem:[#allocation4_spill]] %s3007_s2 }
   0x4 LB: > { %s40_s30 = sadd.s32 1, %s2474_s28  ;;  %p1994_p0 = scmp.ge.s32.totalorder %s2478_s29, 1  ;;  %s2478_s29 = sphi %s2582_s29, %s28_s29   ;;  %s2474_s28 = sphi %s2580_s28, %s3031_s28   ;;  %s2470_s27 = sphi %s2578_s27, %s3030_s27  }
   0x5   : > { %p42_p1 = scmp.ge.s32.totalorder %s40_s30, 2  ;;  %p568_p2 = scmp.lt.s32.totalorder %s2478_s29, 3 }
   0x7   : > { %s3033_s30 = smov (%p42_p1, %s40_s30), 0  ;;  %p569_p3 = pnand %p1994_p0, %p568_p2 }
   0x8   : > { %v723_v0 = vld [vmem:[%s3010_s5] sm:$0xff] (!%p569_p3)  ;;  %p648_p4 = scmp.lt.s32.totalorder (!%p569_p3), %s2470_s27, 1  ;;  %v2480_v1 = vmov (!%p569_p3), 0.0   ;;  %v2353_v3 = vld [vmem:[%s3012_s7 + $0x8] sm:$0xff] (!%p569_p3)   ;;  %vm748_vm0 = vcmask (!%p569_p3), 64512   ;;  %s3027_s25 = sld [smem:[#allocation3_spill]] (!%p569_p3) }
   0x9   : > { %572 = sbr.rel (%p569_p3) target bundleno = 2244 (0x8c4), region = 92  ;;  %2169 = vmatprep.subr.mxu0 (!%p569_p3), %v723_v0  ;;  %2174 = vmatprep.subr.bf16.mxu1 (!%p569_p3), %v2480_v1  ;;  %v2352_v2 = vld [vmem:[%s3012_s7] sm:$0xff] (!%p569_p3)   ;;  %v2354_v6 = vld [vmem:[%s3012_s7 + $0x10] sm:$0xff] (!%p569_p3)   ;;  %v2355_v7 = vld [vmem:[%s3012_s7 + $0x18] sm:$0xff] (!%p569_p3)   ;;  %vm2481_vm1 = vmmov (!%p569_p3), 0   ;;  %s3028_s19 = sld [smem:[#allocation2_spill]] (!%p569_p3) }
   0xa   : > { %2170 = vmatpush3.msra.mxu0 (!%p569_p3), %v723_v0  ;;  %2175 = vmatpush3.bf16.msra.mxu1 (!%p569_p3), %v2352_v2  ;;  %v2356_v8 = vld [vmem:[%s3012_s7 + $0x20] sm:$0xff] (!%p569_p3)   ;;  %v2357_v9 = vld [vmem:[%s3012_s7 + $0x28] sm:$0xff] (!%p569_p3)   ;;  %v2358_v10 = vld [vmem:[%s3012_s7 + $0x30] sm:$0xff] (!%p569_p3)   ;;  %s3029_s24 = sld [smem:[#allocation4_spill]] (!%p569_p3) }
   0xb   : > { %2194 = vmatprep.subr.bf16.mxu0 (!%p569_p3), %v2480_v1  ;;  %2176 = vmatprep.subr.bf16.mxu1 (!%p569_p3), %v2480_v1  ;;  %v2359_v11 = vld [vmem:[%s3012_s7 + $0x38] sm:$0xff] (!%p569_p3)   ;;  %v2360_v12 = vld [vmem:[%s3014_s9] sm:$0xff] (!%p569_p3)   ;;  %v2361_v13 = vld [vmem:[%s3014_s9 + $0x8] sm:$0xff] (!%p569_p3)  }
   0xc   : > { %2190 = vmatprep.mubr.msk.bf16.mxu1 (!%p569_p3), %vm2481_vm1, %v2480_v1  ;;  %v2362_v14 = vld [vmem:[%s3014_s9 + $0x10] sm:$0xff] (!%p569_p3)   ;;  %v2363_v15 = vld [vmem:[%s3014_s9 + $0x18] sm:$0xff] (!%p569_p3)   ;;  %v2364_v16 = vld [vmem:[%s3014_s9 + $0x20] sm:$0xff] (!%p569_p3)  }
   0xd   : > { %v2365_v17 = vld [vmem:[%s3014_s9 + $0x28] sm:$0xff] (!%p569_p3)   ;;  %v2003_v18 = vld [vmem:[%s3011_s6] ss:$0 sm:$0xff] (!%p569_p3)  ;;  %v2366_v26 = vld [vmem:[%s3014_s9 + $0x30] sm:$0xff] (!%p569_p3)  }
   0xe   : > { %2177 = vmatpush3.bf16.msra.mxu1 (!%p569_p3), %v2353_v3  ;;  %v2367_v27 = vld [vmem:[%s3014_s9 + $0x38] sm:$0xff] (!%p569_p3)   ;;  %v707_v30 = vld [vmem:[%s3009_s4] sm:$0xff] (!%p569_p3)  ;;  %v708_v31 = vld [vmem:[%s3009_s4 + $0x8] sm:$0xff] (!%p569_p3) }
   0xf   : > { %2178 = vmatprep.subr.bf16.mxu1 (!%p569_p3), %v2480_v1  ;;  %v2289_v36 = vpack.c.bf16 (!%p569_p3), %v708_v31, %v707_v30  ;;  %v709_v37 = vld [vmem:[%s3009_s4 + $0x10] sm:$0xff] (!%p569_p3)  ;;  %v710_v38 = vld [vmem:[%s3009_s4 + $0x18] sm:$0xff] (!%p569_p3)  ;;  %v711_v45 = vld [vmem:[%s3009_s4 + $0x20] sm:$0xff] (!%p569_p3) }
  0x10   : > { %s3035_s27 = smov (!%p648_p4, %s2470_s27), 1  ;;  %v2293_v41 = vpack.c.bf16 %v710_v38, %v709_v37  ;;  %v712_v47 = vld [vmem:[%s3009_s4 + $0x28] sm:$0xff]  ;;  %v2006_v52 = vld [vmem:[%s3013_s8] ss:$0 sm:$0xff]  ;;  %v713_v3 = vld [vmem:[%s3009_s4 + $0x30] sm:$0xff] }
  0x11   : > { %s2610_s2 = sshll.u32 %s3035_s27, 4  ;;  %v2297_v50 = vpack.c.bf16 %v712_v47, %v711_v45 }
  0x12   : > { %s665_s26 = scalar_lea.vmem %s3027_s25, %s2610_s2  ;;  %2179 = vmatpush3.bf16.msra.mxu1 %v2354_v6  ;;  %s2088_s25 = sshll.u32 %s3035_s27, 7 }
  0x13   : > { %v688_v4 = vld [vmem:[%s665_s26] sm:$0xff]  ;;  %v689_v5 = vld [vmem:[%s665_s26 + $0x8] sm:$0xff]  ;;  %2180 = vmatprep.subr.bf16.mxu1 %v2480_v1  ;;  %s2686_s20 = scalar_lea.vmem %s3008_s3, %s2088_s25  ;;  %s655_s1 = scalar_lea.vmem %s3028_s19, %s2610_s2 }
  0x14   : > { %2171 = vmatprep.mubr.msk.f32.mxu0 %vm748_vm0, %v688_v4  ;;  %v691_v28 = vld [vmem:[%s2686_s20] sm:$0xff]  ;;  %v692_v29 = vld [vmem:[%s2686_s20 + $0x8] sm:$0xff]  ;;  %v693_v33 = vld [vmem:[%s2686_s20 + $0x10] sm:$0xff]  ;;  %s669_s25 = scalar_lea.vmem %s3029_s24, %s3035_s27  ;;  %s683_s0 = scalar_lea.vmem %s3023_s18, %s2610_s2 }
  0x15   : > { %2172 = vmatmul.mubr.msk.f32.vlgmr.msra.gmra.mrb[0].mxu0 %vm748_vm0, %v689_v5  ;;  %v1048_v32 = vmul.f32 %v707_v30, %v691_v28  ;;  %v694_v34 = vld [vmem:[%s2686_s20 + $0x18] sm:$0xff]  ;;  %v1049_v35 = vmul.f32 %v708_v31, %v692_v29  ;;  %v1050_v39 = vmul.f32 %v709_v37, %v693_v33  ;;  %v695_v43 = vld [vmem:[%s2686_s20 + $0x20] sm:$0xff]  ;;  %v696_v44 = vld [vmem:[%s2686_s20 + $0x28] sm:$0xff] }
  0x16   : > { %2181 = vmatpush3.bf16.msra.mxu1 %v2355_v7  ;;  %2210 = vmatprep.mubr.msk.bf16.mxu0 %vm2481_vm1, %v2480_v1  ;;  %v1051_v40 = vmul.f32 %v710_v38, %v694_v34  ;;  %v1052_v48 = vmul.f32 %v711_v45, %v695_v43  ;;  %v1053_v49 = vmul.f32 %v712_v47, %v696_v44  ;;  %v2722_v56 = vld [vmem:[%s655_s1] sm:$0xff]  ;;  %v2724_v57 = vld [vmem:[%s655_s1 + $0x8] sm:$0xff]  ;;  %v697_v0 = vld [vmem:[%s2686_s20 + $0x30] sm:$0xff] }
  0x17   : > { %2182 = vmatprep.subr.bf16.mxu1 %v2480_v1  ;;  %2195 = vmatpush3.bf16.msra.mxu0 %v2360_v12  ;;  %v1064_v42 = vpack.c.bf16 %v1049_v35, %v1048_v32  ;;  %v698_v2 = vld [vmem:[%s2686_s20 + $0x38] sm:$0xff]  ;;  %v1054_v5 = vmul.f32 %v713_v3, %v697_v0  ;;  %v716_v12 = vld [vmem:[%s3009_s4 + $0x48] sm:$0xff]  ;;  %v705_v33 = vld [vmem:[%s2686_s20 + $0x70] sm:$0xff] }
  0x18   : > { %2196 = vmatprep.subr.bf16.mxu0 %v2480_v1  ;;  %v1065_v46 = vpack.c.bf16 %v1051_v40, %v1050_v39  ;;  %v1066_v51 = vpack.c.bf16 %v1053_v49, %v1052_v48  ;;  %v714_v4 = vld [vmem:[%s3009_s4 + $0x38] sm:$0xff]  ;;  %v720_v28 = vld [vmem:[%s3009_s4 + $0x68] sm:$0xff]  ;;  %v721_v35 = vld [vmem:[%s3009_s4 + $0x70] sm:$0xff] }
  0x19   : > { %v1055_v6 = vmul.f32 %v714_v4, %v698_v2  ;;  %v2301_v7 = vpack.c.bf16 %v714_v4, %v713_v3  ;;  %v706_v34 = vld [vmem:[%s2686_s20 + $0x78] sm:$0xff]  ;;  %v1062_v37 = vmul.f32 %v721_v35, %v705_v33  ;;  %v2372_v2 = vld [vmem:[%s3015_s10 + $0x20] sm:$0xff]   ;;  %v2373_v3 = vld [vmem:[%s3015_s10 + $0x28] sm:$0xff]  }
  0x1a   : > { %2183 = vmatpush3.bf16.msra.mxu1 %v2356_v8  ;;  %v2371_v0 = vld [vmem:[%s3015_s10 + $0x18] sm:$0xff]   ;;  %v2374_v4 = vld [vmem:[%s3015_s10 + $0x30] sm:$0xff]  }
  0x1b   : > { %2184 = vmatprep.subr.bf16.mxu1 %v2480_v1  ;;  %2197 = vmatpush3.bf16.msra.mxu0 %v2361_v13  ;;  %v1067_v8 = vpack.c.bf16 %v1055_v6, %v1054_v5  ;;  %v2375_v5 = vld [vmem:[%s3015_s10 + $0x38] sm:$0xff]  }
  0x1c   : > { %2198 = vmatprep.subr.bf16.mxu0 %v2480_v1 }
  0x1e   : > { %2185 = vmatpush3.bf16.msra.mxu1 %v2357_v9  ;;  %v699_v9 = vld [vmem:[%s2686_s20 + $0x40] sm:$0xff] }
  0x1f   : > { %2186 = vmatprep.subr.bf16.mxu1 %v2480_v1  ;;  %2199 = vmatpush3.bf16.msra.mxu0 %v2362_v14 }
  0x20   : > { %2200 = vmatprep.subr.bf16.mxu0 %v2480_v1 }
  0x22   : > { %2187 = vmatpush3.bf16.msra.mxu1 %v2358_v10  ;;  %v700_v10 = vld [vmem:[%s2686_s20 + $0x48] sm:$0xff] }
  0x23   : > { %2188 = vmatprep.subr.bf16.mxu1 %v2480_v1  ;;  %2201 = vmatpush3.bf16.msra.mxu0 %v2363_v15  ;;  %v1057_v14 = vmul.f32 %v716_v12, %v700_v10 }
  0x24   : > { %2202 = vmatprep.subr.bf16.mxu0 %v2480_v1 }
  0x26   : > { %2189 = vmatpush3.bf16.msra.mxu1 %v2359_v11  ;;  %v715_v11 = vld [vmem:[%s3009_s4 + $0x40] sm:$0xff] }
  0x27   : > { %2214 = vmatprep.subr.bf16.mxu1 %v2480_v1  ;;  %2203 = vmatpush3.bf16.msra.mxu0 %v2364_v16  ;;  %v1056_v13 = vmul.f32 %v715_v11, %v699_v9  ;;  %v2305_v15 = vpack.c.bf16 %v716_v12, %v715_v11 }
  0x28   : > { %2204 = vmatprep.subr.bf16.mxu0 %v2480_v1 }
  0x29   : > { %v1068_v16 = vpack.c.bf16 %v1057_v14, %v1056_v13 }
  0x2b   : > { %2205 = vmatpush3.bf16.msra.mxu0 %v2365_v17  ;;  %v701_v17 = vld [vmem:[%s2686_s20 + $0x50] sm:$0xff] }
  0x2c   : > { %2206 = vmatprep.subr.bf16.mxu0 %v2480_v1 }
  0x2f   : > { %2207 = vmatpush3.bf16.msra.mxu0 %v2366_v26  ;;  %v704_v26 = vld [vmem:[%s2686_s20 + $0x68] sm:$0xff] }
  0x30   : > { %2208 = vmatprep.subr.bf16.mxu0 %v2480_v1  ;;  %v1061_v30 = vmul.f32 %v720_v28, %v704_v26 }
  0x33   : > { %2209 = vmatpush3.bf16.msra.mxu0 %v2367_v27  ;;  %v719_v27 = vld [vmem:[%s3009_s4 + $0x60] sm:$0xff] }
  0x34   : > { %2290 = vmatprep.subr.bf16.mxu0 %v2289_v36  ;;  %v2313_v31 = vpack.c.bf16 %v720_v28, %v719_v27 }
  0xe8   : > { %v2173_v19 = vpop.f32.mrb[0].mxu0 }
  0xe9   : > { %v827_v20 = vadd.f32 %v2173_v19, %v2003_v18  ;;  %v821_v21 = vpop.f32.mrb[1].mxu0  ;;  %v717_v19 = vld [vmem:[%s3009_s4 + $0x50] sm:$0xff] }
  0xea   : > { %v822_v22 = vadd.f32 %v2003_v18, %v821_v21  ;;  %v702_v18 = vld [vmem:[%s2686_s20 + $0x58] sm:$0xff]  ;;  %v1058_v21 = vmul.f32 %v717_v19, %v701_v17 }
  0xeb   : > { %v831_v23 = vmax.f32 %v827_v20, 0.0  ;;  %v718_v20 = vld [vmem:[%s3009_s4 + $0x58] sm:$0xff] }
  0xec   : > { %v830_v24 = vmax.f32 %v822_v22, 0.0  ;;  %v1059_v22 = vmul.f32 %v718_v20, %v702_v18 }
  0xee   : > { %v832_v25 = vpack.c.bf16 %v831_v23, %v830_v24  ;;  %v2309_v23 = vpack.c.bf16 %v718_v20, %v717_v19  ;;  %v1069_v24 = vpack.c.bf16 %v1059_v22, %v1058_v21 }
  0xf0   : > { %2191 = vmatmul.mubr.bf16.vlgmr.msra.gmra.mrb[0].mxu1 %v832_v25  ;;  %v703_v25 = vld [vmem:[%s2686_s20 + $0x60] sm:$0xff] }
  0xf1   : > { %2230 = vmatprep.mubr.msk.bf16.mxu1 %vm2481_vm1, %v2480_v1  ;;  %2215 = vmatpush3.bf16.msra.mxu1 %v1064_v42  ;;  %v1060_v29 = vmul.f32 %v719_v27, %v703_v25  ;;  %v2378_v25 = vld [vmem:[%s3019_s14 + $0x4] ss:$8 sps:$4 sm:$0xff]  }
  0xf2   : > { %2216 = vmatprep.subr.bf16.mxu1 %v2480_v1 }
  0xf3   : > { %v1070_v32 = vpack.c.bf16 %v1061_v30, %v1060_v29 }
  0xf5   : > { %2217 = vmatpush3.bf16.msra.mxu1 %v1065_v46 }
  0xf6   : > { %2218 = vmatprep.subr.bf16.mxu1 %v2480_v1 }
  0xf9   : > { %2219 = vmatpush3.bf16.msra.mxu1 %v1066_v51 }
  0xfa   : > { %2220 = vmatprep.subr.bf16.mxu1 %v2480_v1 }
  0xfd   : > { %2221 = vmatpush3.bf16.msra.mxu1 %v1067_v8 }
  0xfe   : > { %2222 = vmatprep.subr.bf16.mxu1 %v2480_v1 }
 0x101   : > { %2223 = vmatpush3.bf16.msra.mxu1 %v1068_v16 }
 0x102   : > { %2224 = vmatprep.subr.bf16.mxu1 %v2480_v1 }
 0x105   : > { %2225 = vmatpush3.bf16.msra.mxu1 %v1069_v24  ;;  %v2376_v24 = vld [vmem:[%s3019_s14] ss:$8 sps:$4 sm:$0xff]  }
 0x106   : > { %2226 = vmatprep.subr.bf16.mxu1 %v2480_v1 }
 0x109   : > { %2227 = vmatpush3.bf16.msra.mxu1 %v1070_v32 }
 0x10a   : > { %2228 = vmatprep.subr.bf16.mxu1 %v2480_v1 }
 0x1c3   : > { %v921_v53 = vpop.f32.mrb[0].mxu1 }
 0x1c4   : > { %v922_v54 = vadd.f32 %v2006_v52, %v921_v53  ;;  %v2192_v55 = vpop.f32.mrb[1].mxu1 }
 0x1c5   : > { %v924_v58 = vpop.f32.mrb[2].mxu1 }
 0x1c6   : > { %v925_v59 = vadd.f32 %v2006_v52, %v924_v58  ;;  %v2193_v60 = vpop.f32.mrb[3].mxu1  ;;  %v928_v61 = vadd.f32 %v922_v54, %v2722_v56 }
 0x1c8   : > { %v929_v62 = vadd.f32 %v925_v59, %v2724_v57  ;;  %v2368_v59 = vld [vmem:[%s3015_s10] sm:$0xff]  }
 0x1ca   : > { %v930_v63 = vpack.c.bf16 %v929_v62, %v928_v61  ;;  %v2369_v62 = vld [vmem:[%s3015_s10 + $0x8] sm:$0xff]  }
 0x1cc   : > { %2211 = vmatmul.mubr.bf16.vlgmr.msra.gmra.mrb[4].mxu0 %v930_v63  ;;  %v2370_v63 = vld [vmem:[%s3015_s10 + $0x10] sm:$0xff]  }
 0x1cd   : > { %2292 = vmatpush3.bf16.msra.mxu0 %v2289_v36  ;;  %v722_v36 = vld [vmem:[%s3009_s4 + $0x78] sm:$0xff] }
 0x1ce   : > { %2294 = vmatprep.subr.bf16.mxu0 %v2293_v41  ;;  %v1063_v38 = vmul.f32 %v722_v36, %v706_v34  ;;  %v2317_v39 = vpack.c.bf16 %v722_v36, %v721_v35  ;;  %v2381_v34 = vld [vmem:[%s3019_s14 + $0x14] ss:$8 sps:$4 sm:$0xff]   ;;  %v2379_v35 = vld [vmem:[%s3019_s14 + $0x10] ss:$8 sps:$4 sm:$0xff]   ;;  %v2384_v36 = vld [vmem:[%s3019_s14 + $0x24] ss:$8 sps:$4 sm:$0xff]  }
 0x1d0   : > { %v1071_v40 = vpack.c.bf16 %v1063_v38, %v1062_v37  ;;  %v2382_v37 = vld [vmem:[%s3019_s14 + $0x20] ss:$8 sps:$4 sm:$0xff]   ;;  %v2387_v38 = vld [vmem:[%s3019_s14 + $0x34] ss:$8 sps:$4 sm:$0xff]  }
 0x1d1   : > { %2296 = vmatpush3.bf16.msra.mxu0 %v2293_v41 }
 0x1d2   : > { %2298 = vmatprep.subr.bf16.mxu0 %v2297_v50  ;;  %2229 = vmatpush3.bf16.msra.mxu1 %v1071_v40  ;;  %v2388_v40 = vld [vmem:[%s3019_s14 + $0x40] ss:$8 sps:$4 sm:$0xff]  }
 0x1d3   : > { %2269 = vmatprep.subr.bf16.mxu1 %v2480_v1 }
 0x1d5   : > { %2300 = vmatpush3.bf16.msra.mxu0 %v2297_v50  ;;  %v2023_v50 = vld [vmem:[%s669_s25] ss:$0 sm:$0xff] }
 0x1d6   : > { %2302 = vmatprep.subr.bf16.mxu0 %v2301_v7 }
 0x1d9   : > { %2304 = vmatpush3.bf16.msra.mxu0 %v2301_v7 }
 0x1da   : > { %2306 = vmatprep.subr.bf16.mxu0 %v2305_v15 }
 0x1dd   : > { %2308 = vmatpush3.bf16.msra.mxu0 %v2305_v15 }
 0x1de   : > { %2310 = vmatprep.subr.bf16.mxu0 %v2309_v23 }
 0x1e1   : > { %2312 = vmatpush3.bf16.msra.mxu0 %v2309_v23 }
 0x1e2   : > { %2314 = vmatprep.subr.bf16.mxu0 %v2313_v31 }
 0x1e5   : > { %2316 = vmatpush3.bf16.msra.mxu0 %v2313_v31 }
 0x1e6   : > { %2318 = vmatprep.subr.bf16.mxu0 %v2317_v39 }
 0x1e9   : > { %2320 = vmatpush3.bf16.msra.mxu0 %v2317_v39  ;;  %v2385_v39 = vld [vmem:[%s3019_s14 + $0x30] ss:$8 sps:$4 sm:$0xff]  }
 0x1ea   : > { %1471 = vmatprep.subr.bf16.mxu0 %v2378_v25 }
 0x29f   : > { %v1029_v41 = vpop.f32.mrb[4].mxu0 }
 0x2a0   : > { %v1040_v42 = vmin.f32 %v1029_v41, 0.0  ;;  %v2212_v43 = vpop.f32.mrb[5].mxu0  ;;  %v1038_v49 = vadd.f32 1.0, %v1029_v41  ;;  %vm1036_vm2 = vcmp.gt.f32.partialorder %v1029_v41, 0.0  ;;  %v2390_v41 = vld [vmem:[%s3019_s14 + $0x44] ss:$8 sps:$4 sm:$0xff]  }
 0x2a1   : > { %v1032_v44 = vpop.f32.mrb[6].mxu0  ;;  %v2391_v43 = vld [vmem:[%s3019_s14 + $0x50] ss:$8 sps:$4 sm:$0xff]  }
 0x2a2   : > { %v1042_v45 = vmul.f32 1.442695, %v1040_v42  ;;  %v1041_v46 = vmin.f32 %v1032_v44, 0.0  ;;  %v2213_v47 = vpop.f32.mrb[7].mxu0  ;;  %v1039_v52 = vadd.f32 1.0, %v1032_v44  ;;  %vm1037_vm3 = vcmp.gt.f32.partialorder %v1032_v44, 0.0 }
 0x2a3   : > { %v2393_v42 = vld [vmem:[%s3019_s14 + $0x54] ss:$8 sps:$4 sm:$0xff]   ;;  %v2482_v44 = vmov 0  }
 0x2a4   : > { %2440 = vpow2.f32 %v1042_v45  ;;  %v1044_v48 = vmul.f32 1.442695, %v1041_v46  ;;  %v2396_v45 = vld [vmem:[%s3019_s14 + $0x64] ss:$8 sps:$4 sm:$0xff]   ;;  %v2394_v46 = vld [vmem:[%s3019_s14 + $0x60] ss:$8 sps:$4 sm:$0xff]  }
 0x2a5   : > { %v2399_v47 = vld [vmem:[%s3019_s14 + $0x74] ss:$8 sps:$4 sm:$0xff]  }
 0x2a6   : > { %2442 = vpow2.f32 %v1044_v48  ;;  %v2397_v48 = vld [vmem:[%s3019_s14 + $0x70] ss:$8 sps:$4 sm:$0xff]  }
 0x2ae   : > { %v2441_v51 = vpop.eup %2440 }
 0x2af   : > { %v1046_v53 = vsel %vm1036_vm2, %v1038_v49, %v2441_v51  ;;  %v2402_v49 = vld [vmem:[%s3018_s13 + $0x4] ss:$8 sps:$4 sm:$0xff]  }
 0x2b0   : > { %v2443_v54 = vpop.eup %2442  ;;  %v1120_v55 = vmul.f32 %v2023_v50, %v1046_v53  ;;  %v2425_v51 = vld [vmem:[%s3020_s15] sm:$0xff]  }
 0x2b1   : > { %v1047_v58 = vsel %vm1037_vm3, %v1039_v52, %v2443_v54  ;;  %v2426_v52 = vld [vmem:[%s3020_s15 + $0x48] sm:$0xff]   ;;  %v2428_v54 = vld [vmem:[%s3020_s15 + $0x50] sm:$0xff]  }
 0x2b2   : > { %v1072_v60 = vpack.c.bf16 %v1047_v58, %v1046_v53  ;;  %v1121_v61 = vmul.f32 %v2023_v50, %v1047_v58  ;;  %2266 = vmatprep.mubr.f32.mxu0 %v1120_v55  ;;  %v2424_v50 = vld [vmem:[%s3020_s15 + $0x40] sm:$0xff]   ;;  %v2427_v53 = vld [vmem:[%s3020_s15 + $0x8] sm:$0xff]   ;;  %v2429_v55 = vld [vmem:[%s3020_s15 + $0x10] sm:$0xff]  }
 0x2b3   : > { %v2430_v58 = vld [vmem:[%s3020_s15 + $0x58] sm:$0xff]  }
 0x2b4   : > { %2231 = vmatmul.mubr.bf16.vlgmr.msra.gmra.mrb[4].mxu1 %v1072_v60  ;;  %2267 = vmatmul.mubr.f32.vlgmr.msra.gmra.mrb[2].mxu0 %v1121_v61  ;;  %v2432_v60 = vld [vmem:[%s3020_s15 + $0x60] sm:$0xff]  }
 0x2b5   : > { %2270 = vmatpush3.bf16.msra.mxu1 %v2368_v59  ;;  %2285 = vmatprep.mubr.msk.bf16.mxu1 %vm2481_vm1, %v2480_v1  ;;  %v2431_v59 = vld [vmem:[%s3020_s15 + $0x18] sm:$0xff]   ;;  %v2433_v61 = vld [vmem:[%s3020_s15 + $0x20] sm:$0xff]  }
 0x2b6   : > { %2271 = vmatprep.subr.bf16.mxu1 %v2480_v1  ;;  %1472 = vmatpush1.bf16.msra.mxu0 %v2376_v24  ;;  %v2400_v24 = vld [vmem:[%s3018_s13] ss:$8 sps:$4 sm:$0xff]  }
 0x2b7   : > { %1473 = vmatprep.subr.bf16.mxu0 %v2381_v34  ;;  %1503 = vmatprep.mubr.bf16.mxu0 %v2482_v44  ;;  %v2417_v34 = vld [vmem:[%s3018_s13 + $0x54] ss:$8 sps:$4 sm:$0xff]  }
 0x2b9   : > { %2272 = vmatpush3.bf16.msra.mxu1 %v2369_v62  ;;  %v2434_v62 = vld [vmem:[%s3020_s15 + $0x68] sm:$0xff]  }
 0x2ba   : > { %2273 = vmatprep.subr.bf16.mxu1 %v2480_v1  ;;  %1474 = vmatpush1.bf16.msra.mxu0 %v2379_v35  ;;  %v2415_v35 = vld [vmem:[%s3018_s13 + $0x50] ss:$8 sps:$4 sm:$0xff]  }
 0x2bb   : > { %1475 = vmatprep.subr.bf16.mxu0 %v2384_v36  ;;  %v2420_v36 = vld [vmem:[%s3018_s13 + $0x64] ss:$8 sps:$4 sm:$0xff]  }
 0x2bd   : > { %2274 = vmatpush3.bf16.msra.mxu1 %v2370_v63  ;;  %v2435_v63 = vld [vmem:[%s3020_s15 + $0x28] sm:$0xff]  }
 0x2be   : > { %2275 = vmatprep.subr.bf16.mxu1 %v2480_v1  ;;  %1476 = vmatpush1.bf16.msra.mxu0 %v2382_v37  ;;  %v2418_v37 = vld [vmem:[%s3018_s13 + $0x60] ss:$8 sps:$4 sm:$0xff]  }
 0x2bf   : > { %1477 = vmatprep.subr.bf16.mxu0 %v2387_v38  ;;  %v2423_v38 = vld [vmem:[%s3018_s13 + $0x74] ss:$8 sps:$4 sm:$0xff]  }
 0x2c1   : > { %2276 = vmatpush3.bf16.msra.mxu1 %v2371_v0 }
 0x2c2   : > { %2277 = vmatprep.subr.bf16.mxu1 %v2480_v1  ;;  %1478 = vmatpush1.bf16.msra.mxu0 %v2385_v39  ;;  %v2421_v39 = vld [vmem:[%s3018_s13 + $0x70] ss:$8 sps:$4 sm:$0xff]  }
 0x2c3   : > { %1479 = vmatprep.subr.bf16.mxu0 %v2390_v41  ;;  %v2436_v41 = vld [vmem:[%s3020_s15 + $0x70] sm:$0xff]  }
 0x2c5   : > { %2278 = vmatpush3.bf16.msra.mxu1 %v2372_v2 }
 0x2c6   : > { %2279 = vmatprep.subr.bf16.mxu1 %v2480_v1  ;;  %1480 = vmatpush1.bf16.msra.mxu0 %v2388_v40  ;;  %v1357_v40 = vpack.c.bf16 %v2724_v57, %v2722_v56 }
 0x2c7   : > { %1481 = vmatprep.subr.bf16.mxu0 %v2393_v42  ;;  %v2437_v42 = vld [vmem:[%s3020_s15 + $0x30] sm:$0xff]  }
 0x2c9   : > { %2280 = vmatpush3.bf16.msra.mxu1 %v2373_v3 }
 0x2ca   : > { %2281 = vmatprep.subr.bf16.mxu1 %v2480_v1  ;;  %1482 = vmatpush1.bf16.msra.mxu0 %v2391_v43  ;;  %v2438_v43 = vld [vmem:[%s3020_s15 + $0x78] sm:$0xff]  }
 0x2cb   : > { %1483 = vmatprep.subr.bf16.mxu0 %v2396_v45 }
 0x2cd   : > { %2282 = vmatpush3.bf16.msra.mxu1 %v2374_v4 }
 0x2ce   : > { %2283 = vmatprep.subr.bf16.mxu1 %v2480_v1  ;;  %1484 = vmatpush1.bf16.msra.mxu0 %v2394_v46 }
 0x2cf   : > { %1485 = vmatprep.subr.bf16.mxu0 %v2399_v47 }
 0x2d1   : > { %2284 = vmatpush3.bf16.msra.mxu1 %v2375_v5 }
 0x2d2   : > { %1486 = vmatpush1.bf16.msra.mxu0 %v2397_v48  ;;  %2147 = vmatprep.subr.bf16.mxu1 %v2424_v50 }
 0x2d3   : > { %1594 = vmatprep.subr.bf16.mxu0 %v2402_v49 }
 0x387   : > { %v1107_v6 = vpop.f32.mrb[4].mxu1  ;;  %v2268_v7 = vpop.f32.mrb[2].mxu0 }
 0x388   : > { %v1194_v8 = vadd.f32 1e-06, %v2268_v7  ;;  %v2232_v9 = vpop.f32.mrb[5].mxu1  ;;  %v1188_v10 = vpop.f32.mrb[3].mxu0 }
 0x389   : > { %v1189_v11 = vadd.f32 1e-06, %v1188_v10  ;;  %v1110_v12 = vpop.f32.mrb[6].mxu1 }
 0x38a   : > { %2444 = vrcp.f32 %v1194_v8  ;;  %v2233_v13 = vpop.f32.mrb[7].mxu1 }
 0x38b   : > { %2446 = vrcp.f32 %v1189_v11 }
 0x394   : > { %v2445_v14 = vpop.eup %2444 }
 0x395   : > { %v2447_v15 = vpop.eup %2446  ;;  %v1200_v16 = vmul.f32 %v2445_v14, %v1110_v12 }
 0x396   : > { %v1199_v17 = vmul.f32 %v2447_v15, %v1107_v6 }
 0x397   : > { %v1202_v1 = vmul.f32 16.0, %v1200_v16 }
 0x398   : > { %v1201_v18 = vmul.f32 16.0, %v1199_v17  ;;  %v2032_v17 = vld [vmem:[%s3016_s11] ss:$0 sm:$0xff] }
 0x39a   : > { %v1203_v19 = vpack.c.bf16 %v1202_v1, %v1201_v18 }
 0x39c   : > { %2286 = vmatmul.mubr.bf16.vlgmr.msra.gmra.mrb[8].mxu1 %v1203_v19 }
 0x39d   : > { %2148 = vmatpush3.bf16.msra.mxu1 %v2425_v51 }
 0x39e   : > { %2149 = vmatprep.subr.bf16.mxu1 %v2426_v52 }
 0x3a1   : > { %2150 = vmatpush3.bf16.msra.mxu1 %v2427_v53 }
 0x3a2   : > { %2151 = vmatprep.subr.bf16.mxu1 %v2428_v54 }
 0x3a5   : > { %2152 = vmatpush3.bf16.msra.mxu1 %v2429_v55 }
 0x3a6   : > { %2153 = vmatprep.subr.bf16.mxu1 %v2430_v58 }
 0x3a9   : > { %2154 = vmatpush3.bf16.msra.mxu1 %v2431_v59 }
 0x3aa   : > { %2155 = vmatprep.subr.bf16.mxu1 %v2432_v60 }
 0x3ad   : > { %2156 = vmatpush3.bf16.msra.mxu1 %v2433_v61 }
 0x3ae   : > { %2157 = vmatprep.subr.bf16.mxu1 %v2434_v62 }
 0x3b1   : > { %2158 = vmatpush3.bf16.msra.mxu1 %v2435_v63 }
 0x3b2   : > { %2159 = vmatprep.subr.bf16.mxu1 %v2436_v41 }
 0x3b5   : > { %2160 = vmatpush3.bf16.msra.mxu1 %v2437_v42 }
 0x3b6   : > { %2161 = vmatprep.subr.bf16.mxu1 %v2438_v43 }
 0x46f   : > { %v1302_v20 = vpop.f32.mrb[8].mxu1 }
 0x470   : > { %1311 = vadd.xlane.f32.xlu0 %v1302_v20  ;;  %v2287_v21 = vpop.f32.mrb[9].mxu1 }
 0x471   : > { %v1305_v22 = vpop.f32.mrb[10].mxu1 }
 0x472   : > { %v2288_v23 = vpop.f32.mrb[11].mxu1 }
 0x474   : > { %1313 = vadd.xlane.f32.xlu0 %v1305_v22 }
 0x4fd   : > { %v1312_v26 = vpop.xlane.xlu0 %1311 }
 0x4fe   : > { %v2816_v27 = vmul.f32 0.03125, %v1312_v26  ;;  %v2405_v26 = vld [vmem:[%s3018_s13 + $0x14] ss:$8 sps:$4 sm:$0xff]  }
 0x500   : > { %v2819_v28 = vsub.f32 %v1302_v20, %v2816_v27  ;;  %v1325_v0 = vmul.f32 96.0, %v2816_v27  ;;  %v2033_v20 = vld [vmem:[%s3017_s12] ss:$0 sm:$0xff] }
 0x501   : > { %v1314_v29 = vpop.xlane.xlu0 %1313 }
 0x502   : > { %v2821_v30 = vmul.f32 0.03125, %v1314_v29  ;;  %v1319_v31 = vmul.f32 %v2819_v28, %v2819_v28  ;;  %v1327_v2 = vmul.f32 %v1325_v0, %v2816_v27  ;;  %v2403_v27 = vld [vmem:[%s3018_s13 + $0x10] ss:$8 sps:$4 sm:$0xff]   ;;  %v2406_v29 = vld [vmem:[%s3018_s13 + $0x20] ss:$8 sps:$4 sm:$0xff]  }
 0x504   : > { %1321 = vadd.xlane.f32.xlu1 %v1319_v31  ;;  %v2826_v32 = vsub.f32 %v1305_v22, %v2821_v30  ;;  %v1326_v3 = vmul.f32 96.0, %v2821_v30  ;;  %v2409_v31 = vld [vmem:[%s3018_s13 + $0x30] ss:$8 sps:$4 sm:$0xff]  }
 0x506   : > { %v1320_v33 = vmul.f32 %v2826_v32, %v2826_v32  ;;  %v1328_v7 = vmul.f32 %v1326_v3, %v2821_v30  ;;  %v2411_v30 = vld [vmem:[%s3018_s13 + $0x34] ss:$8 sps:$4 sm:$0xff]  }
 0x508   : > { %1323 = vadd.xlane.f32.xlu1 %v1320_v33  ;;  %v2412_v33 = vld [vmem:[%s3018_s13 + $0x40] ss:$8 sps:$4 sm:$0xff]  }
 0x591   : > { %v1322_v4 = vpop.xlane.xlu1 %1321 }
 0x592   : > { %v1329_v5 = vsub.f32 %v1322_v4, %v1327_v2 }
 0x594   : > { %v1331_v6 = vmul.f32 0.03125, %v1329_v5 }
 0x595   : > { %v1324_v8 = vpop.xlane.xlu1 %1323 }
 0x596   : > { %v1333_v9 = vmax.f32 %v1331_v6, 0.0  ;;  %v1330_v10 = vsub.f32 %v1324_v8, %v1328_v7 }
 0x598   : > { %v1335_v11 = vadd.f32 1e-05, %v1333_v9  ;;  %v1332_v12 = vmul.f32 0.03125, %v1330_v10 }
 0x59a   : > { %2448 = vrsqrt.f32 %v1335_v11  ;;  %v1334_v13 = vmax.f32 %v1332_v12, 0.0 }
 0x59c   : > { %v1336_v14 = vadd.f32 1e-05, %v1334_v13 }
 0x59e   : > { %2450 = vrsqrt.f32 %v1336_v14 }
 0x5a4   : > { %v2449_v15 = vpop.eup %2448 }
 0x5a5   : > { %v1339_v16 = vmul.f32 %v2449_v15, %v2819_v28  ;;  %v2408_v28 = vld [vmem:[%s3018_s13 + $0x24] ss:$8 sps:$4 sm:$0xff]  }
 0x5a7   : > { %v1347_v19 = vmul.f32 %v2032_v17, %v1339_v16 }
 0x5a8   : > { %v2451_v1 = vpop.eup %2450 }
 0x5a9   : > { %v1340_v18 = vmul.f32 %v2451_v1, %v2826_v32  ;;  %v1355_v22 = vadd.f32 %v2033_v20, %v1347_v19  ;;  %v2414_v32 = vld [vmem:[%s3018_s13 + $0x44] ss:$8 sps:$4 sm:$0xff]  }
 0x5ab   : > { %v1348_v21 = vmul.f32 %v2032_v17, %v1340_v18 }
 0x5ad   : > { %v1356_v23 = vadd.f32 %v2033_v20, %v1348_v21 }
 0x5af   : > { %v1374_v25 = vpack.c.bf16 %v1356_v23, %v1355_v22  ;;  %v2082_v22 = vld [vmem:[%s3021_s16] ss:$0 sm:$0xff] }
 0x5b1   : > { %1504 = vmatmul.mubr.bf16.vlgmr.msra.gmra.mrb[8].mxu0 %v1374_v25  ;;  %v2083_v25 = vld [vmem:[%s3022_s17] ss:$0 sm:$0xff] }
 0x5b2   : > { %1595 = vmatpush1.bf16.msra.mxu0 %v2400_v24  ;;  %1626 = vmatprep.mubr.bf16.mxu0 %v2482_v44  ;;  %v2439_v44 = vld [vmem:[%s3020_s15 + $0x38] sm:$0xff]  }
 0x5b3   : > { %1596 = vmatprep.subr.bf16.mxu0 %v2405_v26  ;;  %2162 = vmatpush3.bf16.msra.mxu1 %v2439_v44 }
 0x5b6   : > { %1597 = vmatpush1.bf16.msra.mxu0 %v2403_v27 }
 0x5b7   : > { %1598 = vmatprep.subr.bf16.mxu0 %v2408_v28 }
 0x5ba   : > { %1599 = vmatpush1.bf16.msra.mxu0 %v2406_v29 }
 0x5bb   : > { %1600 = vmatprep.subr.bf16.mxu0 %v2411_v30 }
 0x5be   : > { %1601 = vmatpush1.bf16.msra.mxu0 %v2409_v31 }
 0x5bf   : > { %1602 = vmatprep.subr.bf16.mxu0 %v2414_v32 }
 0x5c2   : > { %1603 = vmatpush1.bf16.msra.mxu0 %v2412_v33 }
 0x5c3   : > { %1604 = vmatprep.subr.bf16.mxu0 %v2417_v34 }
 0x5c6   : > { %1605 = vmatpush1.bf16.msra.mxu0 %v2415_v35 }
 0x5c7   : > { %1606 = vmatprep.subr.bf16.mxu0 %v2420_v36 }
 0x5ca   : > { %1607 = vmatpush1.bf16.msra.mxu0 %v2418_v37 }
 0x5cb   : > { %1608 = vmatprep.subr.bf16.mxu0 %v2423_v38 }
 0x5ce   : > { %1609 = vmatpush1.bf16.msra.mxu0 %v2421_v39 }
 0x5d1   : > { %1627 = vmatmul.mubr.bf16.vlgmr.msra.gmra.mrb[8].mxu0 %v1357_v40 }
 0x6a4   : > { %v1628_v45 = vpop.f32.mrb[8].mxu0 }
 0x6a5   : > { %v1630_v46 = vpop.f32.mrb[9].mxu0  ;;  %v1637_v48 = vmax.f32 %v1628_v45, 0.0 }
 0x6a6   : > { %v1632_v47 = vpop.f32.mrb[10].mxu0  ;;  %v1638_v51 = vmax.f32 %v1630_v46, 0.0 }
 0x6a7   : > { %v1639_v49 = vmax.f32 %v1632_v47, 0.0  ;;  %v1634_v50 = vpop.f32.mrb[11].mxu0 }
 0x6a8   : > { %v1640_v52 = vmax.f32 %v1634_v50, 0.0 }
 0x6a9   : > { %v1641_v53 = vpack.c.bf16 %v1639_v49, %v1637_v48 }
 0x6aa   : > { %v1642_v54 = vpack.c.bf16 %v1640_v52, %v1638_v51 }
 0x6ac   : > { %1803 = vmatprep.mubr.bf16.mxu1 %v1642_v54 }
 0x6ad   : > { %1804 = vmatmul.mubr.bf16.vlgmr.msra.gmra.mrb[12].mxu1 %v1641_v53 }
 0x780   : > { %v2163_v55 = vpop.f32.mrb[12].mxu1 }
 0x781   : > { %v2164_v58 = vpop.f32.mrb[13].mxu1 }
 0x782   : > { %v2165_v59 = vadd.f32 %v2164_v58, %v2163_v55  ;;  %v2166_v60 = vpop.f32.mrb[14].mxu1 }
 0x783   : > { %v2167_v61 = vpop.f32.mrb[15].mxu1 }
 0x784   : > { %v2168_v62 = vadd.f32 %v2167_v61, %v2166_v60  ;;  %1814 = vadd.xlane.f32.xlu0 %v2165_v59 }
 0x786   : > { %1816 = vadd.xlane.f32.xlu1 %v2168_v62 }
 0x811   : > { %v1815_v63 = vpop.xlane.xlu0 %1814 }
 0x812   : > { %v1818_v0 = vmul.f32 0.03125, %v1815_v63 }
 0x813   : > { %v1817_v2 = vpop.xlane.xlu1 %1816 }
 0x814   : > { %v1819_v3 = vmul.f32 0.03125, %v1817_v2  ;;  %v1820_v4 = vsub.f32 %v2165_v59, %v1818_v0  ;;  %v1828_v8 = vmul.f32 96.0, %v1818_v0 }
 0x816   : > { %v1822_v5 = vmul.f32 %v1820_v4, %v1820_v4  ;;  %v1821_v6 = vsub.f32 %v2168_v62, %v1819_v3  ;;  %v1829_v9 = vmul.f32 96.0, %v1819_v3  ;;  %v1830_v10 = vmul.f32 %v1828_v8, %v1818_v0 }
 0x818   : > { %1824 = vadd.xlane.f32.xlu0 %v1822_v5  ;;  %v1823_v7 = vmul.f32 %v1821_v6, %v1821_v6  ;;  %v1831_v13 = vmul.f32 %v1829_v9, %v1819_v3 }
 0x81a   : > { %1826 = vadd.xlane.f32.xlu1 %v1823_v7 }
 0x8a5   : > { %v1825_v11 = vpop.xlane.xlu0 %1824 }
 0x8a6   : > { %v1832_v12 = vsub.f32 %v1825_v11, %v1830_v10 }
 0x8a7   : > { %v1827_v14 = vpop.xlane.xlu1 %1826 }
 0x8a8   : > { %v1834_v15 = vmul.f32 0.03125, %v1832_v12  ;;  %v1833_v16 = vsub.f32 %v1827_v14, %v1831_v13 }
 0x8aa   : > { %v1836_v17 = vmax.f32 %v1834_v15, 0.0  ;;  %v1835_v1 = vmul.f32 0.03125, %v1833_v16 }
 0x8ac   : > { %v1838_v18 = vadd.f32 1e-05, %v1836_v17  ;;  %v1837_v19 = vmax.f32 %v1835_v1, 0.0 }
 0x8ae   : > { %2452 = vrsqrt.f32 %v1838_v18  ;;  %v1839_v20 = vadd.f32 1e-05, %v1837_v19 }
 0x8b0   : > { %2454 = vrsqrt.f32 %v1839_v20 }
 0x8b8   : > { %v2453_v21 = vpop.eup %2452 }
 0x8b9   : > { %v1842_v23 = vmul.f32 %v2453_v21, %v1820_v4 }
 0x8ba   : > { %v2455_v24 = vpop.eup %2454 }
 0x8bb   : > { %v1850_v26 = vmul.f32 %v2082_v22, %v1842_v23  ;;  %v1843_v27 = vmul.f32 %v2455_v24, %v1821_v6 }
 0x8bd   : > { %v1858_v28 = vadd.f32 %v2083_v25, %v1850_v26  ;;  %v1851_v29 = vmul.f32 %v2082_v22, %v1843_v27 }
 0x8bf   : > { %v1860_v30 = vadd.f32 %v1858_v28, %v2722_v56  ;;  %v1859_v31 = vadd.f32 %v2083_v25, %v1851_v29 }
 0x8c1   : > { %1862 = vst [vmem:[%s683_s0] sm:$0xff] %v1860_v30  ;;  %v1861_v32 = vadd.f32 %v1859_v31, %v2724_v57 }
 0x8c3   : > { %1863 = vst [vmem:[%s683_s0 + $0x8] sm:$0xff] %v1861_v32 }
 0x8c4 PF: > { %s28_s29 = sadd.s32 1, %s2478_s29   ;;  %s3030_s27 = smov %s2474_s28 }
 0x8c5   : > { %p25_p5 = scmp.ge.s32.totalorder %s28_s29, 4   ;;  %s3031_s28 = smov %s3033_s30 }
 0x8c7   :  { %27 = sbr.rel (!%p25_p5) target bundleno = 4 (0x4), region = 131 }

</bundles_post_ra>
